<compile_context>
chip_gen: v7x
topology: tpu7x:2x2x1
jax: 0.10.0
libtpu: 0.0.40
codegen_flags: <defaults>
</compile_context>

<pallas_src>
import jax
import jax.numpy as jnp
import numpy as np
from jax import lax
from jax.experimental import pallas as pl
from jax.experimental.pallas import tpu as pltpu


# ---------------------------------------------------------------------------
# Fused Pallas kernel: one batch element per grid step, H and W folded into
# the lane axis, three MXU dots total.
# ---------------------------------------------------------------------------
def _hr_bottleneck_kernel(x_ref, w1_ref, b1_ref, w2_ref, b2_ref, w3_ref, b3_ref,
                          o_ref):
    """Fused bottleneck for one batch element.

    x_ref : (1, D, HW*Cin)        bf16  input slab (also the identity residual)
    w1_ref: (HW*Cin, HW*Cmid)     bf16  conv1 block-diag weights, BN1 folded
    b1_ref: (1, HW*Cmid)          f32
    w2_ref: (3*HW*Cmid, HW*Cmid)  bf16  conv2: kh/kw + boundary zeros + BN2
                                        folded; 3 kd taps stacked along K
    b2_ref: (1, HW*Cmid)          f32
    w3_ref: (HW*Cmid, HW*Cout)    bf16  conv3 block-diag weights, BN3 folded
    b3_ref: (1, HW*Cout)          f32
    o_ref : (1, D, HW*Cout)       bf16  output slab
    """
    _, D, _ = x_ref.shape
    HWCmid = w1_ref.shape[1]

    x2d = x_ref[0]                                              # (D, HW*Cin) bf16

    # ---- conv1 (1x1x1) + BN1 + ReLU --------------------------------------
    t1 = jnp.dot(x2d, w1_ref[...], preferred_element_type=jnp.float32)
    t1 = jnp.maximum(t1 + b1_ref[...], 0.0).astype(jnp.bfloat16)   # (D, HW*Cmid)

    # ---- conv2 (3x3x3, pad=1) + BN2 + ReLU --------------------------------
    # kh/kw taps and H/W zero padding live inside w2_ref; the 3 kd taps are
    # fused into one wide-K dot by concatenating the depth-shifted windows of
    # t1 along the lane axis (zero rows = depth zero padding).
    zrow = jnp.zeros((1, HWCmid), jnp.bfloat16)
    up = jnp.concatenate([zrow, t1[:D - 1]], axis=0)     # row d holds t1[d-1]
    down = jnp.concatenate([t1[1:], zrow], axis=0)       # row d holds t1[d+1]
    lhs = jnp.concatenate([up, t1, down], axis=-1)       # (D, 3*HW*Cmid)
    t2 = jnp.dot(lhs, w2_ref[...], preferred_element_type=jnp.float32)
    t2 = jnp.maximum(t2 + b2_ref[...], 0.0).astype(jnp.bfloat16)   # (D, HW*Cmid)

    # ---- conv3 (1x1x1) + BN3 + identity residual + ReLU -------------------
    y = jnp.dot(t2, w3_ref[...], preferred_element_type=jnp.float32)
    y = y + b3_ref[...] + x2d.astype(jnp.float32)
    o_ref[0] = jnp.maximum(y, 0.0).astype(o_ref.dtype)


# ---------------------------------------------------------------------------
# One-time (init-time, host-side) parameter transform: fold BN scales into the
# conv weights and block-diagonalize across the (H, W) spatial positions that
# are folded into the lane axis.  This is NOT part of the jitted forward.
# ---------------------------------------------------------------------------
def fold_params(params, H, W, dtype=jnp.bfloat16):
    w1, s1, b1, w2, s2, b2, w3, s3, b3 = [np.asarray(p, np.float32) for p in params]
    Cin, Cmid = w1.shape
    Cout = w3.shape[1]
    HW = H * W

    # Fold the eval-mode BN scale into the conv output channels.
    w1f = w1 * s1[None, :]                                       # (Cin, Cmid)
    w2f = w2 * s2[None, None, None, None, :]                     # (3,3,3,Cmid,Cmid) DHWIO
    w3f = w3 * s3[None, :]                                       # (Cmid, Cout)

    eye_hw = np.eye(HW, dtype=np.float32)
    # Block-diagonal over spatial positions: rows = (pos, cin), cols = (pos, cout).
    w1b = np.einsum("pq,io->piqo", eye_hw, w1f).reshape(HW * Cin, HW * Cmid)
    w3b = np.einsum("pq,io->piqo", eye_hw, w3f).reshape(HW * Cmid, HW * Cout)

    def shift(n, k):
        # S[in, out] = 1 iff in == out + k - 1 (zero outside -> boundary padding)
        s = np.zeros((n, n), np.float32)
        for o in range(n):
            i = o + k - 1
            if 0 <= i < n:
                s[i, o] = 1.0
        return s

    # conv2: fold kh/kw (+ their boundary zeros) into shifted block-diagonal
    # (HW*Cmid, HW*Cmid) matrices, one per kd tap; stack the 3 kd taps along K
    # in the order [d-1, d, d+1] to match the kernel's lane-concatenated LHS.
    taps = []
    for kd in range(3):
        m = np.zeros((HW * Cmid, HW * Cmid), np.float32)
        for kh in range(3):
            for kw in range(3):
                m += np.einsum("ab,cd,io->acibdo", shift(H, kh), shift(W, kw),
                               w2f[kd, kh, kw]).reshape(HW * Cmid, HW * Cmid)
        taps.append(m)
    w2b = np.concatenate(taps, axis=0)                           # (3*HW*Cmid, HW*Cmid)

    b1b = np.tile(b1, HW).reshape(1, HW * Cmid)
    b2b = np.tile(b2, HW).reshape(1, HW * Cmid)
    b3b = np.tile(b3, HW).reshape(1, HW * Cout)

    return (jnp.asarray(w1b, dtype), jnp.asarray(b1b, jnp.float32),
            jnp.asarray(w2b, dtype), jnp.asarray(b2b, jnp.float32),
            jnp.asarray(w3b, dtype), jnp.asarray(b3b, jnp.float32))


# ---------------------------------------------------------------------------
# HRBottlneck forward (single fused pallas_call + layout glue at the boundary)
# ---------------------------------------------------------------------------
def hr_bottleneck_forward(x_ncdhw, folded, H, W):
    w1b, b1b, w2b, b2b, w3b, b3b = folded
    N, Cin, D, H_, W_ = x_ncdhw.shape
    assert (H_, W_) == (H, W)
    HWCin = H * W * Cin
    HWCmid = w1b.shape[1]
    HWCout = w3b.shape[1]
    assert HWCout == HWCin, "identity residual requires inplanes == planes * expansion"

    # NCDHW -> (N, D, H*W*C): channels-last with H and W folded into lanes.
    x = jnp.transpose(x_ncdhw, (0, 2, 3, 4, 1)).reshape(N, D, HWCin)
    x = x.astype(jnp.bfloat16)

    # VMEM budget: double-buffered activation blocks + single-counted resident
    # weights/biases (constant index maps), plus fixed headroom for in-kernel
    # temporaries.  Well below every generation's scoped/physical limits.
    in_blk = D * HWCin * 2
    out_blk = D * HWCout * 2
    wgt = (w1b.size + w2b.size + w3b.size) * 2 + (b1b.size + b2b.size + b3b.size) * 4
    vmem_est = 2 * (in_blk + out_blk) + wgt
    vmem_limit = int(min(max(vmem_est + (6 << 20), 8 << 20), 32 << 20))

    out = pl.pallas_call(
        _hr_bottleneck_kernel,
        out_shape=jax.ShapeDtypeStruct((N, D, HWCout), jnp.bfloat16),
        grid_spec=pltpu.PrefetchScalarGridSpec(
            num_scalar_prefetch=0,
            grid=(N,),
            in_specs=[
                pl.BlockSpec((1, D, HWCin), lambda n: (n, 0, 0)),     # x slab
                pl.BlockSpec((HWCin, HWCmid), lambda n: (0, 0)),      # w1b
                pl.BlockSpec((1, HWCmid), lambda n: (0, 0)),          # b1b
                pl.BlockSpec((3 * HWCmid, HWCmid), lambda n: (0, 0)), # w2b
                pl.BlockSpec((1, HWCmid), lambda n: (0, 0)),          # b2b
                pl.BlockSpec((HWCmid, HWCout), lambda n: (0, 0)),     # w3b
                pl.BlockSpec((1, HWCout), lambda n: (0, 0)),          # b3b
            ],
            out_specs=pl.BlockSpec((1, D, HWCout), lambda n: (n, 0, 0)),
        ),
        compiler_params=pltpu.CompilerParams(
            dimension_semantics=("parallel",),
            vmem_limit_bytes=vmem_limit,
        ),
    )(x, w1b, b1b, w2b, b2b, w3b, b3b)

    Cout = HWCout // (H * W)
    out = out.reshape(N, D, H, W, Cout)
    return jnp.transpose(out, (0, 4, 1, 2, 3))   # back to NCDHW (bf16)


# ---------------------------------------------------------------------------
# Pure-JAX reference (f32) for correctness checking
# ---------------------------------------------------------------------------
def hr_bottleneck_reference(x_ncdhw, params):
    w1, s1, b1, w2, s2, b2, w3, s3, b3 = params
    x = jnp.transpose(x_ncdhw, (0, 2, 3, 4, 1)).astype(jnp.float32)

    t1 = jax.nn.relu(jnp.einsum("ndhwc,co->ndhwo", x, w1) * s1 + b1)
    t2 = lax.conv_general_dilated(
        t1, w2, window_strides=(1, 1, 1), padding="SAME",
        dimension_numbers=("NDHWC", "DHWIO", "NDHWC"))
    t2 = jax.nn.relu(t2 * s2 + b2)
    t3 = jnp.einsum("ndhwc,co->ndhwo", t2, w3) * s3 + b3
    out = jax.nn.relu(t3 + x)
    return jnp.transpose(out, (0, 4, 1, 2, 3))


# ---------------------------------------------------------------------------
# Deterministic parameter initialization (eval-mode BN as scale/bias)
# ---------------------------------------------------------------------------
def init_params(key, inplanes, planes, expansion=4):
    ks = jax.random.split(key, 12)
    outplanes = planes * expansion
    eps = 1e-5

    def bn_fold(kg, kb, km, kv, c):
        gamma = 1.0 + 0.1 * jax.random.normal(kg, (c,), jnp.float32)
        beta = 0.1 * jax.random.normal(kb, (c,), jnp.float32)
        mean = 0.1 * jax.random.normal(km, (c,), jnp.float32)
        var = jax.random.uniform(kv, (c,), jnp.float32, 0.5, 1.5)
        scale = gamma / jnp.sqrt(var + eps)
        bias = beta - mean * scale
        return scale, bias

    w1 = 0.2 * jax.random.normal(ks[0], (inplanes, planes), jnp.float32)
    w2 = 0.2 * jax.random.normal(ks[1], (3, 3, 3, planes, planes), jnp.float32)  # DHWIO
    w3 = 0.2 * jax.random.normal(ks[2], (planes, outplanes), jnp.float32)
    s1, b1 = bn_fold(ks[3], ks[4], ks[5], ks[6], planes)
    s2, b2 = bn_fold(ks[7], ks[8], ks[9], ks[10], planes)
    s3, b3 = bn_fold(ks[11], ks[3], ks[7], ks[0], outplanes)
    return (w1, s1, b1, w2, s2, b2, w3, s3, b3)


# ---------------------------------------------------------------------------
if __name__ == "__main__":
    key = jax.random.PRNGKey(0)
    k_x, k_p = jax.random.split(key)

    # inplanes must equal planes * expansion for the identity residual path.
    N, D, H, W = 2, 8, 8, 8
    planes, expansion = 4, 4
    inplanes = planes * expansion  # 16

    x = jax.random.normal(k_x, (N, inplanes, D, H, W), jnp.float32)  # NCDHW
    params = init_params(k_p, inplanes, planes, expansion)

    # One-time parameter transform (init time, NOT inside the jitted forward).
    folded = jax.tree.map(jax.device_put, fold_params(params, H, W))

    fwd = jax.jit(hr_bottleneck_forward, static_argnums=(2, 3))
    out = jax.block_until_ready(fwd(x, folded, H, W))

    ref = hr_bottleneck_reference(x, params)
    assert out.shape == (N, inplanes, D, H, W)
    out_f32 = out.astype(jnp.float32)
    max_err = float(jnp.max(jnp.abs(out_f32 - ref)))
    # bf16 activations/weights/output with f32 accumulation -> relaxed tolerance.
    assert jnp.allclose(out_f32, ref, rtol=5e-2, atol=1e-1), \
        f"Pallas output mismatch vs reference (max |diff| = {max_err})"

    print("KERNEL_OK")
</pallas_src>

<mosaic_0001>
module attributes {stable_mosaic.version = 11 : i64} {
  func.func @_hr_bottleneck_kernel(%arg0: i32, %arg1: memref<1x8x1024xbf16, #tpu.memory_space<vmem>>, %arg2: memref<1024x256xbf16, #tpu.memory_space<vmem>>, %arg3: memref<1x256xf32, #tpu.memory_space<vmem>>, %arg4: memref<768x256xbf16, #tpu.memory_space<vmem>>, %arg5: memref<1x256xf32, #tpu.memory_space<vmem>>, %arg6: memref<256x1024xbf16, #tpu.memory_space<vmem>>, %arg7: memref<1x1024xf32, #tpu.memory_space<vmem>>, %arg8: memref<1x8x1024xbf16, #tpu.memory_space<vmem>>) attributes {dimension_semantics = [#tpu.dimension_semantics<parallel>], iteration_bounds = array<i64: 2>, scalar_prefetch = 0 : i64, scratch_operands = 0 : i64, tpu.core_type = #tpu.core_type<tc>, window_params = [{transform_indices = @transform_0, window_bounds = array<i64: 1, 8, 1024>}, {pipeline_mode = #tpu.pipeline_mode<synchronous>, transform_indices = @transform_1, window_bounds = array<i64: 1024, 256>}, {pipeline_mode = #tpu.pipeline_mode<synchronous>, transform_indices = @transform_2, window_bounds = array<i64: 1, 256>}, {pipeline_mode = #tpu.pipeline_mode<synchronous>, transform_indices = @transform_3, window_bounds = array<i64: 768, 256>}, {pipeline_mode = #tpu.pipeline_mode<synchronous>, transform_indices = @transform_4, window_bounds = array<i64: 1, 256>}, {pipeline_mode = #tpu.pipeline_mode<synchronous>, transform_indices = @transform_5, window_bounds = array<i64: 256, 1024>}, {pipeline_mode = #tpu.pipeline_mode<synchronous>, transform_indices = @transform_6, window_bounds = array<i64: 1, 1024>}, {transform_indices = @transform_7, window_bounds = array<i64: 1, 8, 1024>}]} {
    %c0 = arith.constant 0 : index
    %c0_0 = arith.constant 0 : index
    %c0_1 = arith.constant 0 : index
    %0 = vector.load %arg1[%c0, %c0_0, %c0_1] : memref<1x8x1024xbf16, #tpu.memory_space<vmem>>, vector<1x8x1024xbf16>
    %1 = vector.shape_cast %0 : vector<1x8x1024xbf16> to vector<8x1024xbf16>
    %c0_2 = arith.constant 0 : index
    %c0_3 = arith.constant 0 : index
    %2 = vector.load %arg2[%c0_2, %c0_3] : memref<1024x256xbf16, #tpu.memory_space<vmem>>, vector<1024x256xbf16>
    %cst = arith.constant dense<0.000000e+00> : vector<8x256xf32>
    %3 = tpu.matmul %1, %2, %cst {dimension_numbers = #tpu.dot_dimension_numbers<[1], [0], [0], [1], [0, 0, 1, 1], [], []>} : vector<8x1024xbf16>, vector<1024x256xbf16>, vector<8x256xf32> -> vector<8x256xf32>
    %c0_4 = arith.constant 0 : index
    %c0_5 = arith.constant 0 : index
    %4 = vector.load %arg3[%c0_4, %c0_5] : memref<1x256xf32, #tpu.memory_space<vmem>>, vector<1x256xf32>
    %5 = vector.broadcast %4 : vector<1x256xf32> to vector<8x256xf32>
    %6 = arith.addf %3, %5 : vector<8x256xf32>
    %cst_6 = arith.constant 0.000000e+00 : f32
    %7 = vector.broadcast %cst_6 : f32 to vector<8x256xf32>
    %8 = arith.maximumf %6, %7 : vector<8x256xf32>
    %9 = arith.truncf %8 : vector<8x256xf32> to vector<8x256xbf16>
    %cst_7 = arith.constant 0.000000e+00 : bf16
    %10 = vector.broadcast %cst_7 : bf16 to vector<1x256xbf16>
    %11 = vector.extract_strided_slice %9 {offsets = [0, 0], sizes = [7, 256], strides = [1, 1]} : vector<8x256xbf16> to vector<7x256xbf16>
    %12 = tpu.concatenate %10, %11 in 0 : vector<1x256xbf16>, vector<7x256xbf16> -> vector<8x256xbf16>
    %13 = vector.extract_strided_slice %9 {offsets = [1, 0], sizes = [7, 256], strides = [1, 1]} : vector<8x256xbf16> to vector<7x256xbf16>
    %14 = tpu.concatenate %13, %10 in 0 : vector<7x256xbf16>, vector<1x256xbf16> -> vector<8x256xbf16>
    %15 = tpu.concatenate %12, %9, %14 in 1 : vector<8x256xbf16>, vector<8x256xbf16>, vector<8x256xbf16> -> vector<8x768xbf16>
    %c0_8 = arith.constant 0 : index
    %c0_9 = arith.constant 0 : index
    %16 = vector.load %arg4[%c0_8, %c0_9] : memref<768x256xbf16, #tpu.memory_space<vmem>>, vector<768x256xbf16>
    %cst_10 = arith.constant dense<0.000000e+00> : vector<8x256xf32>
    %17 = tpu.matmul %15, %16, %cst_10 {dimension_numbers = #tpu.dot_dimension_numbers<[1], [0], [0], [1], [0, 0, 1, 1], [], []>} : vector<8x768xbf16>, vector<768x256xbf16>, vector<8x256xf32> -> vector<8x256xf32>
    %c0_11 = arith.constant 0 : index
    %c0_12 = arith.constant 0 : index
    %18 = vector.load %arg5[%c0_11, %c0_12] : memref<1x256xf32, #tpu.memory_space<vmem>>, vector<1x256xf32>
    %19 = vector.broadcast %18 : vector<1x256xf32> to vector<8x256xf32>
    %20 = arith.addf %17, %19 : vector<8x256xf32>
    %cst_13 = arith.constant 0.000000e+00 : f32
    %21 = vector.broadcast %cst_13 : f32 to vector<8x256xf32>
    %22 = arith.maximumf %20, %21 : vector<8x256xf32>
    %23 = arith.truncf %22 : vector<8x256xf32> to vector<8x256xbf16>
    %c0_14 = arith.constant 0 : index
    %c0_15 = arith.constant 0 : index
    %24 = vector.load %arg6[%c0_14, %c0_15] : memref<256x1024xbf16, #tpu.memory_space<vmem>>, vector<256x1024xbf16>
    %cst_16 = arith.constant dense<0.000000e+00> : vector<8x1024xf32>
    %25 = tpu.matmul %23, %24, %cst_16 {dimension_numbers = #tpu.dot_dimension_numbers<[1], [0], [0], [1], [0, 0, 1, 1], [], []>} : vector<8x256xbf16>, vector<256x1024xbf16>, vector<8x1024xf32> -> vector<8x1024xf32>
    %c0_17 = arith.constant 0 : index
    %c0_18 = arith.constant 0 : index
    %26 = vector.load %arg7[%c0_17, %c0_18] : memref<1x1024xf32, #tpu.memory_space<vmem>>, vector<1x1024xf32>
    %27 = vector.broadcast %26 : vector<1x1024xf32> to vector<8x1024xf32>
    %28 = arith.addf %25, %27 : vector<8x1024xf32>
    %29 = arith.extf %1 : vector<8x1024xbf16> to vector<8x1024xf32>
    %30 = arith.addf %28, %29 : vector<8x1024xf32>
    %cst_19 = arith.constant 0.000000e+00 : f32
    %31 = vector.broadcast %cst_19 : f32 to vector<8x1024xf32>
    %32 = arith.maximumf %30, %31 : vector<8x1024xf32>
    %33 = arith.truncf %32 : vector<8x1024xf32> to vector<8x1024xbf16>
    %c0_20 = arith.constant 0 : index
    %c0_21 = arith.constant 0 : index
    %c0_22 = arith.constant 0 : index
    %34 = vector.load %arg8[%c0_20, %c0_21, %c0_22] : memref<1x8x1024xbf16, #tpu.memory_space<vmem>>, vector<1x8x1024xbf16>
    %35 = vector.shape_cast %34 : vector<1x8x1024xbf16> to vector<8x1024xbf16>
    %36 = vector.shape_cast %33 : vector<8x1024xbf16> to vector<1x8x1024xbf16>
    tpu.vector_store %arg8[%c0_20, %c0_21, %c0_22], %36 {strides = array<i32>} : memref<1x8x1024xbf16, #tpu.memory_space<vmem>>, vector<1x8x1024xbf16>,
    return
  }
  func.func @transform_0(%arg0: i32) -> (i32, i32, i32) {
    %c0_i32 = arith.constant 0 : i32
    %c0_i32_0 = arith.constant 0 : i32
    %c0_i32_1 = arith.constant 0 : i32
    return %arg0, %c0_i32, %c0_i32_0 : i32, i32, i32
  }
  func.func @transform_1(%arg0: i32) -> (i32, i32) {
    %c0_i32 = arith.constant 0 : i32
    %c0_i32_0 = arith.constant 0 : i32
    %c0_i32_1 = arith.constant 0 : i32
    return %c0_i32, %c0_i32_0 : i32, i32
  }
  func.func @transform_2(%arg0: i32) -> (i32, i32) {
    %c0_i32 = arith.constant 0 : i32
    %c0_i32_0 = arith.constant 0 : i32
    %c0_i32_1 = arith.constant 0 : i32
    return %c0_i32, %c0_i32_0 : i32, i32
  }
  func.func @transform_3(%arg0: i32) -> (i32, i32) {
    %c0_i32 = arith.constant 0 : i32
    %c0_i32_0 = arith.constant 0 : i32
    %c0_i32_1 = arith.constant 0 : i32
    return %c0_i32, %c0_i32_0 : i32, i32
  }
  func.func @transform_4(%arg0: i32) -> (i32, i32) {
    %c0_i32 = arith.constant 0 : i32
    %c0_i32_0 = arith.constant 0 : i32
    %c0_i32_1 = arith.constant 0 : i32
    return %c0_i32, %c0_i32_0 : i32, i32
  }
  func.func @transform_5(%arg0: i32) -> (i32, i32) {
    %c0_i32 = arith.constant 0 : i32
    %c0_i32_0 = arith.constant 0 : i32
    %c0_i32_1 = arith.constant 0 : i32
    return %c0_i32, %c0_i32_0 : i32, i32
  }
  func.func @transform_6(%arg0: i32) -> (i32, i32) {
    %c0_i32 = arith.constant 0 : i32
    %c0_i32_0 = arith.constant 0 : i32
    %c0_i32_1 = arith.constant 0 : i32
    return %c0_i32, %c0_i32_0 : i32, i32
  }
  func.func @transform_7(%arg0: i32) -> (i32, i32, i32) {
    %c0_i32 = arith.constant 0 : i32
    %c0_i32_0 = arith.constant 0 : i32
    %c0_i32_1 = arith.constant 0 : i32
    return %arg0, %c0_i32, %c0_i32_0 : i32, i32, i32
  }
}

</mosaic_0001>

<bundles_post_ra>
// kernel: hr_bottleneck_forward.1
= control target key start
LH: loop header
LB: loop body
LE: loop exit
PB: predicated region body
PF: predicated region fallthrough
CT: control target
= control target key end

     0   :  { %12 = vsyncpa [#allocation3], 0  ;;  %s3982_s24 = smov 0   ;;  %s4901_s0 = inlined_call_operand.vmem [shape: bf16[2,8,1024], index: 0, kind: input, shape index: {}]   ;;  %s4902_s1 = inlined_call_operand.vmem [shape: bf16[1024,256], index: 1, kind: input, shape index: {}]   ;;  %s4903_s2 = inlined_call_operand.vmem [shape: f32[1,256], index: 2, kind: input, shape index: {}]   ;;  %s4904_s3 = inlined_call_operand.hbm [shape: bf16[768,256], index: 3, kind: input, shape index: {}]   ;;  %s4905_s4 = inlined_call_operand.vmem [shape: f32[1,256], index: 4, kind: input, shape index: {}]   ;;  %s4906_s5 = inlined_call_operand.vmem [shape: bf16[256,1024], index: 5, kind: input, shape index: {}]   ;;  %s4907_s6 = inlined_call_operand.vmem [shape: f32[1,1024], index: 6, kind: input, shape index: {}]   ;;  %s4908_s7 = inlined_call_operand.vmem [shape: bf16[2,8,1024], index: 7, kind: output, shape index: {}]  }
   0x1 LB: > { %s3988_s25 = sadd.s32 4294967295, %s3937_s24   ;;  %p3125_p0 = scmp.ge.s32.totalorder %s3937_s24, 1  ;;  %s3937_s24 = sphi %s3982_s24, %s18_s24  }
   0x2   : > { %p201_p1 = scmp.lt.s32.totalorder %s3937_s24, 3  ;;  %s3939_s26 = smov [#allocation2]  }
   0x3   : > { %s219_s27 = sshll.u32 %s3939_s26, 4  ;;  %p4909_p3 = scmp.eq.s32.totalorder %s3988_s25, 0  ;;  %s220_s27 = int_to_ptr.vmem [resolvable:$true] %s219_s27 }
   0x4   : > { %p3992_p2 = pnand %p3125_p0, %p201_p1  ;;  %s3899_s9 = scalar_lea.hbm %s4904_s3, 12288 }
   0x5   : > { %p3900_p6 = scmp.ne.s32.totalorder %s4904_s3, %s3899_s9  ;;  %p3906_p10 = scmp.lt.u32.totalorder %s3899_s9, %s4904_s3 }
   0x6   : > { %s4911_s28 = scalar_select %p3992_p2, 1, 0 }
   0x7   : > { %p3534_p4 = pneg %p3992_p2 }
   0x9   : > { %p4001_p5 = pnand %p4909_p3, %p3534_p4 }
   0xb   : > { %p3901_p7 = pneg %p4001_p5 }
   0xd   : > { %p3902_p8 = pnand %p3901_p7, %p3900_p6 }
   0xf   : > { %p3903_p9 = pneg %p3902_p8 }
  0x11   : > { %p3908_p11 = pnand %p3906_p10, %p3903_p9 }
  0x13   : > { %3911 = shalt.err (!%p3908_p11)
}
  0x14   : > { %s3912_s14 = scalar_lea.vmem %s220_s27, 12288  ;;  %p3920_p1 = scmp.lt.s32.totalorder %s220_s27, %s220_s27 }
  0x15   : > { %p3913_p12 = scmp.ne.s32.totalorder %s220_s27, %s3912_s14  ;;  %p3921_p4 = scmp.lt.s32.totalorder %s3912_s14, %s3912_s14 }
  0x17   : > { %p3915_p13 = pnand %p3913_p12, %p3901_p7  ;;  %p3922_p3 = por %p3921_p4, %p3920_p1 }
  0x19   : > { %p3916_p0 = pneg %p3915_p13 }
  0x1b   : > { %p3923_p2 = pnand %p3922_p3, %p3916_p0 }
  0x1d   : > { %3926 = shalt.err (!%p3923_p2)
}
  0x1e   : > { %s3940_s15 = smov 128   ;;  %s3941_s16 = smov 8  }
  0x1f   : > { %3537 = dma.hbm_to_vmem [thread:$0]  (!%p4001_p5), %s4904_s3, 12288, %s220_s27, [#allocation3], %s3940_s15, %s3940_s15, %s3941_s16  }
  0x20   : > { %p4913_p6 = scmp.ne.s32.totalorder %s4911_s28, 0 }
  0x21   : > { %p4914_p8 = scmp.eq.s32.totalorder (!%p4913_p6), %s3988_s25, 0 }
  0x22   : > { %252 = sbr.rel (%p4913_p6) target bundleno = 1160 (0x488), region = 48 }
  0x29   : > { %3932 = dma.done.wait (%p4914_p8), [#allocation3], 12288   ;;  %p4915_p7 = pmov %p4914_p8 }
  0x2a   : > { %v3551_v0 = vld [vmem:[%s4902_s1 + $0x4] ss:$8 sps:$4 sm:$0xff]   ;;  %v3553_v1 = vld [vmem:[%s4902_s1] ss:$8 sps:$4 sm:$0xff]   ;;  %v3554_v2 = vld [vmem:[%s4902_s1 + $0x14] ss:$8 sps:$4 sm:$0xff]  }
  0x2b   : > { %3934 = vsyncadd (%p4915_p7), [#allocation3], 4294955008  ;;  %1107 = vmatprep.subr.bf16.mxu0 %v3551_v0  ;;  %v3556_v3 = vld [vmem:[%s4902_s1 + $0x10] ss:$8 sps:$4 sm:$0xff]   ;;  %v3557_v4 = vld [vmem:[%s4902_s1 + $0x24] ss:$8 sps:$4 sm:$0xff]  }
  0x2c   : > { %1108 = vmatpush1.bf16.msra.mxu0 %v3553_v1  ;;  %v3559_v5 = vld [vmem:[%s4902_s1 + $0x20] ss:$8 sps:$4 sm:$0xff]   ;;  %p284_p2 = scmp.lt.s32.totalorder %s3988_s25, 1  ;;  %v3560_v6 = vld [vmem:[%s4902_s1 + $0x34] ss:$8 sps:$4 sm:$0xff]   ;;  %vm1291_vm0 = vcmask 1040384  }
  0x2d   : > { %1109 = vmatprep.subr.bf16.mxu0 %v3554_v2  ;;  %v3562_v7 = vld [vmem:[%s4902_s1 + $0x30] ss:$8 sps:$4 sm:$0xff]   ;;  %v3563_v8 = vld [vmem:[%s4902_s1 + $0x44] ss:$8 sps:$4 sm:$0xff]   ;;  %v3565_v9 = vld [vmem:[%s4902_s1 + $0x40] ss:$8 sps:$4 sm:$0xff]  }
  0x2e   : > { %s4919_s25 = smov (!%p284_p2, %s3988_s25), 1  ;;  %v3566_v10 = vld [vmem:[%s4902_s1 + $0x54] ss:$8 sps:$4 sm:$0xff]   ;;  %v3568_v11 = vld [vmem:[%s4902_s1 + $0x50] ss:$8 sps:$4 sm:$0xff]   ;;  %vm1302_vm3 = vcmask 1043456  }
  0x2f   : > { %s3500_s18 = sshll.u32 %s4919_s25, 5  ;;  %v3569_v12 = vld [vmem:[%s4902_s1 + $0x64] ss:$8 sps:$4 sm:$0xff]   ;;  %v3571_v15 = vld [vmem:[%s4902_s1 + $0x60] ss:$8 sps:$4 sm:$0xff]  }
  0x30   : > { %1110 = vmatpush1.bf16.msra.mxu0 %v3556_v3  ;;  %s4070_s23 = scalar_lea.vmem %s4901_s0, %s3500_s18  ;;  %v3572_v16 = vld [vmem:[%s4902_s1 + $0x74] ss:$8 sps:$4 sm:$0xff]   ;;  %v3574_v17 = vld [vmem:[%s4902_s1 + $0x70] ss:$8 sps:$4 sm:$0xff]   ;;  %v3575_v18 = vld [vmem:[%s4902_s1 + $0x84] ss:$8 sps:$4 sm:$0xff]   ;;  %s4886_s30 = scalar_lea.vmem %s4908_s7, %s3500_s18 }
  0x31   : > { %1111 = vmatprep.subr.bf16.mxu0 %v3557_v4  ;;  %v295_v13 = vld [vmem:[%s4070_s23] sm:$0xff]  ;;  %v3578_v20 = vld [vmem:[%s4902_s1 + $0x94] ss:$8 sps:$4 sm:$0xff]   ;;  %v3580_v21 = vld [vmem:[%s4902_s1 + $0x90] ss:$8 sps:$4 sm:$0xff]  }
  0x32   : > { %v3135_v14 = vcombine.high %v295_v13, %v295_v13  ;;  %v3577_v19 = vld [vmem:[%s4902_s1 + $0x80] ss:$8 sps:$4 sm:$0xff]   ;;  %v3581_v22 = vld [vmem:[%s4902_s1 + $0xa4] ss:$8 sps:$4 sm:$0xff]   ;;  %v3584_v24 = vld [vmem:[%s4902_s1 + $0xb4] ss:$8 sps:$4 sm:$0xff]   ;;  %v3134_v36 = vcombine.low %v295_v13, %v295_v13 }
  0x33   : > { %v3583_v23 = vld [vmem:[%s4902_s1 + $0xa0] ss:$8 sps:$4 sm:$0xff]   ;;  %v3586_v25 = vld [vmem:[%s4902_s1 + $0xb0] ss:$8 sps:$4 sm:$0xff]   ;;  %v3587_v26 = vld [vmem:[%s4902_s1 + $0xc4] ss:$8 sps:$4 sm:$0xff]  }
  0x34   : > { %1112 = vmatpush1.bf16.msra.mxu0 %v3559_v5  ;;  %1139 = vmatprep.mubr.bf16.mxu0 %v3135_v14  ;;  %v3589_v27 = vld [vmem:[%s4902_s1 + $0xc0] ss:$8 sps:$4 sm:$0xff]   ;;  %v3590_v28 = vld [vmem:[%s4902_s1 + $0xd4] ss:$8 sps:$4 sm:$0xff]   ;;  %v3592_v29 = vld [vmem:[%s4902_s1 + $0xd0] ss:$8 sps:$4 sm:$0xff]  }
  0x35   : > { %1113 = vmatprep.subr.bf16.mxu0 %v3560_v6  ;;  %v3593_v30 = vld [vmem:[%s4902_s1 + $0xe4] ss:$8 sps:$4 sm:$0xff]   ;;  %v3595_v31 = vld [vmem:[%s4902_s1 + $0xe0] ss:$8 sps:$4 sm:$0xff]   ;;  %v3596_v32 = vld [vmem:[%s4902_s1 + $0xf4] ss:$8 sps:$4 sm:$0xff]  }
  0x36   : > { %v3598_v33 = vld [vmem:[%s4902_s1 + $0xf0] ss:$8 sps:$4 sm:$0xff]   ;;  %v3602_v34 = vld [vmem:[%s4902_s1 + $0x104] ss:$8 sps:$4 sm:$0xff]   ;;  %v3600_v37 = vld [vmem:[%s4902_s1 + $0x100] ss:$8 sps:$4 sm:$0xff]  }
  0x37   : > { %v4140_v35 = vld [vmem:[%s4070_s23 + $0x8] sm:$0xff]  ;;  %v3606_v39 = vld [vmem:[%s4902_s1 + $0x114] ss:$8 sps:$4 sm:$0xff]   ;;  %v3604_v40 = vld [vmem:[%s4902_s1 + $0x110] ss:$8 sps:$4 sm:$0xff]  }
  0x38   : > { %1114 = vmatpush1.bf16.msra.mxu0 %v3562_v7  ;;  %v3137_v38 = vcombine.high %v4140_v35, %v4140_v35  ;;  %v3609_v41 = vld [vmem:[%s4902_s1 + $0x124] ss:$8 sps:$4 sm:$0xff]   ;;  %v3607_v42 = vld [vmem:[%s4902_s1 + $0x120] ss:$8 sps:$4 sm:$0xff]   ;;  %v3612_v43 = vld [vmem:[%s4902_s1 + $0x134] ss:$8 sps:$4 sm:$0xff]   ;;  %v3136_v7 = vcombine.low %v4140_v35, %v4140_v35 }
  0x39   : > { %1115 = vmatprep.subr.bf16.mxu0 %v3563_v8  ;;  %v3610_v44 = vld [vmem:[%s4902_s1 + $0x130] ss:$8 sps:$4 sm:$0xff]   ;;  %v3615_v45 = vld [vmem:[%s4902_s1 + $0x144] ss:$8 sps:$4 sm:$0xff]   ;;  %v3613_v46 = vld [vmem:[%s4902_s1 + $0x140] ss:$8 sps:$4 sm:$0xff]  }
  0x3a   : > { %v3618_v47 = vld [vmem:[%s4902_s1 + $0x154] ss:$8 sps:$4 sm:$0xff]   ;;  %v3616_v48 = vld [vmem:[%s4902_s1 + $0x150] ss:$8 sps:$4 sm:$0xff]   ;;  %v3621_v49 = vld [vmem:[%s4902_s1 + $0x164] ss:$8 sps:$4 sm:$0xff]  }
  0x3b   : > { %v3619_v50 = vld [vmem:[%s4902_s1 + $0x160] ss:$8 sps:$4 sm:$0xff]   ;;  %v3624_v51 = vld [vmem:[%s4902_s1 + $0x174] ss:$8 sps:$4 sm:$0xff]   ;;  %v3622_v52 = vld [vmem:[%s4902_s1 + $0x170] ss:$8 sps:$4 sm:$0xff]  }
  0x3c   : > { %1116 = vmatpush1.bf16.msra.mxu0 %v3565_v9  ;;  %v3627_v53 = vld [vmem:[%s4902_s1 + $0x184] ss:$8 sps:$4 sm:$0xff]   ;;  %v3625_v54 = vld [vmem:[%s4902_s1 + $0x180] ss:$8 sps:$4 sm:$0xff]   ;;  %v3630_v55 = vld [vmem:[%s4902_s1 + $0x194] ss:$8 sps:$4 sm:$0xff]  }
  0x3d   : > { %1117 = vmatprep.subr.bf16.mxu0 %v3566_v10  ;;  %v3628_v56 = vld [vmem:[%s4902_s1 + $0x190] ss:$8 sps:$4 sm:$0xff]   ;;  %v3633_v57 = vld [vmem:[%s4902_s1 + $0x1a4] ss:$8 sps:$4 sm:$0xff]   ;;  %v3631_v58 = vld [vmem:[%s4902_s1 + $0x1a0] ss:$8 sps:$4 sm:$0xff]  }
  0x3e   : > { %v3636_v59 = vld [vmem:[%s4902_s1 + $0x1b4] ss:$8 sps:$4 sm:$0xff]   ;;  %v3634_v60 = vld [vmem:[%s4902_s1 + $0x1b0] ss:$8 sps:$4 sm:$0xff]   ;;  %v3639_v61 = vld [vmem:[%s4902_s1 + $0x1c4] ss:$8 sps:$4 sm:$0xff]  }
  0x3f   : > { %v3637_v62 = vld [vmem:[%s4902_s1 + $0x1c0] ss:$8 sps:$4 sm:$0xff]   ;;  %v3642_v63 = vld [vmem:[%s4902_s1 + $0x1d4] ss:$8 sps:$4 sm:$0xff]   ;;  %v3640_v0 = vld [vmem:[%s4902_s1 + $0x1d0] ss:$8 sps:$4 sm:$0xff]  }
  0x40   : > { %1118 = vmatpush1.bf16.msra.mxu0 %v3568_v11  ;;  %v3645_v1 = vld [vmem:[%s4902_s1 + $0x1e4] ss:$8 sps:$4 sm:$0xff]   ;;  %v3643_v2 = vld [vmem:[%s4902_s1 + $0x1e0] ss:$8 sps:$4 sm:$0xff]   ;;  %v3648_v3 = vld [vmem:[%s4902_s1 + $0x1f4] ss:$8 sps:$4 sm:$0xff]  }
  0x41   : > { %1119 = vmatprep.subr.bf16.mxu0 %v3569_v12  ;;  %v3646_v4 = vld [vmem:[%s4902_s1 + $0x1f0] ss:$8 sps:$4 sm:$0xff]   ;;  %v3652_v5 = vld [vmem:[%s4902_s1 + $0x204] ss:$8 sps:$4 sm:$0xff]   ;;  %v3650_v8 = vld [vmem:[%s4902_s1 + $0x200] ss:$8 sps:$4 sm:$0xff]  }
  0x42   : > { %v4241_v6 = vld [vmem:[%s4070_s23 + $0x10] sm:$0xff]  ;;  %v3751_v11 = vld [vmem:[#allocation2 + $0x4] ss:$8 sps:$4 sm:$0xff]   ;;  %v3753_v12 = vld [vmem:[#allocation2] ss:$8 sps:$4 sm:$0xff]  }
  0x43   : > { %v3139_v9 = vcombine.high %v4241_v6, %v4241_v6  ;;  %v3656_v10 = vld [vmem:[%s4902_s1 + $0x214] ss:$8 sps:$4 sm:$0xff]   ;;  %v3654_v14 = vld [vmem:[%s4902_s1 + $0x210] ss:$8 sps:$4 sm:$0xff]   ;;  %1895 = vmatprep.subr.bf16.mxu1 %v3751_v11  ;;  %vm1292_vm1 = vsmask.f32 256 }
  0x44   : > { %1120 = vmatpush1.bf16.msra.mxu0 %v3571_v15  ;;  %v3754_v13 = vld [vmem:[#allocation2 + $0x14] ss:$8 sps:$4 sm:$0xff]   ;;  %v3659_v15 = vld [vmem:[%s4902_s1 + $0x224] ss:$8 sps:$4 sm:$0xff]   ;;  %1896 = vmatpush1.bf16.msra.mxu1 %v3753_v12  ;;  %v3710_v11 = vld [vmem:[%s4902_s1 + $0x330] ss:$8 sps:$4 sm:$0xff]  }
  0x45   : > { %1121 = vmatprep.subr.bf16.mxu0 %v3572_v16  ;;  %v3756_v16 = vld [vmem:[#allocation2 + $0x10] ss:$8 sps:$4 sm:$0xff]   ;;  %1897 = vmatprep.subr.bf16.mxu1 %v3754_v13  ;;  %v3674_v35 = vld [vmem:[%s4902_s1 + $0x274] ss:$8 sps:$4 sm:$0xff]   ;;  %v3715_v12 = vld [vmem:[%s4902_s1 + $0x344] ss:$8 sps:$4 sm:$0xff]  }
  0x46   : > { %v3713_v13 = vld [vmem:[%s4902_s1 + $0x340] ss:$8 sps:$4 sm:$0xff]   ;;  %vm1293_vm2 = vmand %vm1291_vm0, %vm1292_vm1  ;;  %vm1303_vm4 = vsmask.f32 3328 }
  0x47   : > { %vm4550_vm5 = vmand %vm1302_vm3, %vm1303_vm4 }
  0x48   : > { %1122 = vmatpush1.bf16.msra.mxu0 %v3574_v17  ;;  %v3757_v17 = vld [vmem:[#allocation2 + $0x24] ss:$8 sps:$4 sm:$0xff]   ;;  %1898 = vmatpush1.bf16.msra.mxu1 %v3756_v16 }
  0x49   : > { %1123 = vmatprep.subr.bf16.mxu0 %v3575_v18  ;;  %v3657_v18 = vld [vmem:[%s4902_s1 + $0x220] ss:$8 sps:$4 sm:$0xff]   ;;  %1899 = vmatprep.subr.bf16.mxu1 %v3757_v17  ;;  %v3721_v16 = vld [vmem:[%s4902_s1 + $0x364] ss:$8 sps:$4 sm:$0xff]  }
  0x4a   : > { %v3719_v17 = vld [vmem:[%s4902_s1 + $0x360] ss:$8 sps:$4 sm:$0xff]  }
  0x4c   : > { %1124 = vmatpush1.bf16.msra.mxu0 %v3577_v19  ;;  %v3662_v19 = vld [vmem:[%s4902_s1 + $0x234] ss:$8 sps:$4 sm:$0xff]  }
  0x4d   : > { %1125 = vmatprep.subr.bf16.mxu0 %v3578_v20  ;;  %v3759_v20 = vld [vmem:[#allocation2 + $0x20] ss:$8 sps:$4 sm:$0xff]  }
  0x4e   : > { %1900 = vmatpush1.bf16.msra.mxu1 %v3759_v20  ;;  %v3727_v20 = vld [vmem:[%s4902_s1 + $0x384] ss:$8 sps:$4 sm:$0xff]  }
  0x50   : > { %1126 = vmatpush1.bf16.msra.mxu0 %v3580_v21  ;;  %v3760_v21 = vld [vmem:[#allocation2 + $0x34] ss:$8 sps:$4 sm:$0xff]  }
  0x51   : > { %1127 = vmatprep.subr.bf16.mxu0 %v3581_v22  ;;  %v3660_v22 = vld [vmem:[%s4902_s1 + $0x230] ss:$8 sps:$4 sm:$0xff]   ;;  %1901 = vmatprep.subr.bf16.mxu1 %v3760_v21  ;;  %v3725_v21 = vld [vmem:[%s4902_s1 + $0x380] ss:$8 sps:$4 sm:$0xff]  }
  0x54   : > { %1128 = vmatpush1.bf16.msra.mxu0 %v3583_v23  ;;  %v3665_v23 = vld [vmem:[%s4902_s1 + $0x244] ss:$8 sps:$4 sm:$0xff]  }
  0x55   : > { %1129 = vmatprep.subr.bf16.mxu0 %v3584_v24  ;;  %v3762_v24 = vld [vmem:[#allocation2 + $0x30] ss:$8 sps:$4 sm:$0xff]  }
  0x56   : > { %1902 = vmatpush1.bf16.msra.mxu1 %v3762_v24  ;;  %v3733_v24 = vld [vmem:[%s4902_s1 + $0x3a4] ss:$8 sps:$4 sm:$0xff]  }
  0x58   : > { %1130 = vmatpush1.bf16.msra.mxu0 %v3586_v25  ;;  %v3763_v25 = vld [vmem:[#allocation2 + $0x44] ss:$8 sps:$4 sm:$0xff]  }
  0x59   : > { %1131 = vmatprep.subr.bf16.mxu0 %v3587_v26  ;;  %v3663_v26 = vld [vmem:[%s4902_s1 + $0x240] ss:$8 sps:$4 sm:$0xff]   ;;  %1903 = vmatprep.subr.bf16.mxu1 %v3763_v25 }
  0x5a   : > { %v3731_v25 = vld [vmem:[%s4902_s1 + $0x3a0] ss:$8 sps:$4 sm:$0xff]  }
  0x5c   : > { %1132 = vmatpush1.bf16.msra.mxu0 %v3589_v27  ;;  %v3668_v27 = vld [vmem:[%s4902_s1 + $0x254] ss:$8 sps:$4 sm:$0xff]  }
  0x5d   : > { %1133 = vmatprep.subr.bf16.mxu0 %v3590_v28  ;;  %v3765_v28 = vld [vmem:[#allocation2 + $0x40] ss:$8 sps:$4 sm:$0xff]  }
  0x5e   : > { %1904 = vmatpush1.bf16.msra.mxu1 %v3765_v28  ;;  %v3739_v28 = vld [vmem:[%s4902_s1 + $0x3c4] ss:$8 sps:$4 sm:$0xff]  }
  0x60   : > { %1134 = vmatpush1.bf16.msra.mxu0 %v3592_v29  ;;  %v3766_v29 = vld [vmem:[#allocation2 + $0x54] ss:$8 sps:$4 sm:$0xff]  }
  0x61   : > { %1135 = vmatprep.subr.bf16.mxu0 %v3593_v30  ;;  %v3666_v30 = vld [vmem:[%s4902_s1 + $0x250] ss:$8 sps:$4 sm:$0xff]   ;;  %1905 = vmatprep.subr.bf16.mxu1 %v3766_v29  ;;  %v3737_v29 = vld [vmem:[%s4902_s1 + $0x3c0] ss:$8 sps:$4 sm:$0xff]  }
  0x64   : > { %1136 = vmatpush1.bf16.msra.mxu0 %v3595_v31  ;;  %v3671_v31 = vld [vmem:[%s4902_s1 + $0x264] ss:$8 sps:$4 sm:$0xff]  }
  0x65   : > { %1137 = vmatprep.subr.bf16.mxu0 %v3596_v32  ;;  %v3768_v32 = vld [vmem:[#allocation2 + $0x50] ss:$8 sps:$4 sm:$0xff]  }
  0x66   : > { %1906 = vmatpush1.bf16.msra.mxu1 %v3768_v32  ;;  %v3745_v32 = vld [vmem:[%s4902_s1 + $0x3e4] ss:$8 sps:$4 sm:$0xff]  }
  0x68   : > { %1138 = vmatpush1.bf16.msra.mxu0 %v3598_v33  ;;  %v3769_v33 = vld [vmem:[#allocation2 + $0x64] ss:$8 sps:$4 sm:$0xff]  }
  0x69   : > { %1148 = vmatprep.subr.bf16.mxu0 %v3602_v34  ;;  %v3669_v34 = vld [vmem:[%s4902_s1 + $0x260] ss:$8 sps:$4 sm:$0xff]   ;;  %1907 = vmatprep.subr.bf16.mxu1 %v3769_v33 }
  0x6a   : > { %v3743_v33 = vld [vmem:[%s4902_s1 + $0x3e0] ss:$8 sps:$4 sm:$0xff]  }
  0x6b   : > { %1140 = vmatmul.mubr.bf16.vlgmr.msra.gmra.mrb[0].mxu0 %v3134_v36  ;;  %v3771_v36 = vld [vmem:[#allocation2 + $0x60] ss:$8 sps:$4 sm:$0xff]  }
  0x6c   : > { %1149 = vmatpush1.bf16.msra.mxu0 %v3600_v37  ;;  %1180 = vmatprep.mubr.bf16.mxu0 %v3137_v38  ;;  %v3772_v37 = vld [vmem:[#allocation2 + $0x74] ss:$8 sps:$4 sm:$0xff]   ;;  %v3672_v38 = vld [vmem:[%s4902_s1 + $0x270] ss:$8 sps:$4 sm:$0xff]  }
  0x6d   : > { %1150 = vmatprep.subr.bf16.mxu0 %v3606_v39  ;;  %v3677_v39 = vld [vmem:[%s4902_s1 + $0x284] ss:$8 sps:$4 sm:$0xff]   ;;  %1908 = vmatpush1.bf16.msra.mxu1 %v3771_v36 }
  0x6e   : > { %1909 = vmatprep.subr.bf16.mxu1 %v3772_v37  ;;  %v3789_v37 = vld [vmem:[#allocation2 + $0xc0] ss:$8 sps:$4 sm:$0xff]  }
  0x70   : > { %1151 = vmatpush1.bf16.msra.mxu0 %v3604_v40  ;;  %v3774_v40 = vld [vmem:[#allocation2 + $0x70] ss:$8 sps:$4 sm:$0xff]  }
  0x71   : > { %1152 = vmatprep.subr.bf16.mxu0 %v3609_v41  ;;  %v3775_v41 = vld [vmem:[#allocation2 + $0x84] ss:$8 sps:$4 sm:$0xff]   ;;  %1910 = vmatpush1.bf16.msra.mxu1 %v3774_v40 }
  0x72   : > { %1911 = vmatprep.subr.bf16.mxu1 %v3775_v41  ;;  %v3793_v40 = vld [vmem:[#allocation2 + $0xe4] ss:$8 sps:$4 sm:$0xff]   ;;  %v3795_v41 = vld [vmem:[#allocation2 + $0xe0] ss:$8 sps:$4 sm:$0xff]  }
  0x74   : > { %1153 = vmatpush1.bf16.msra.mxu0 %v3607_v42  ;;  %v3675_v42 = vld [vmem:[%s4902_s1 + $0x280] ss:$8 sps:$4 sm:$0xff]  }
  0x75   : > { %1154 = vmatprep.subr.bf16.mxu0 %v3612_v43  ;;  %v3680_v43 = vld [vmem:[%s4902_s1 + $0x294] ss:$8 sps:$4 sm:$0xff]  }
  0x78   : > { %1155 = vmatpush1.bf16.msra.mxu0 %v3610_v44  ;;  %v3777_v44 = vld [vmem:[#allocation2 + $0x80] ss:$8 sps:$4 sm:$0xff]  }
  0x79   : > { %1156 = vmatprep.subr.bf16.mxu0 %v3615_v45  ;;  %v3778_v45 = vld [vmem:[#allocation2 + $0x94] ss:$8 sps:$4 sm:$0xff]   ;;  %1912 = vmatpush1.bf16.msra.mxu1 %v3777_v44  ;;  %v3801_v44 = vld [vmem:[#allocation2 + $0x104] ss:$8 sps:$4 sm:$0xff]  }
  0x7a   : > { %1913 = vmatprep.subr.bf16.mxu1 %v3778_v45  ;;  %v429_v45 = vlaneseq }
  0x7c   : > { %1157 = vmatpush1.bf16.msra.mxu0 %v3613_v46  ;;  %v3678_v46 = vld [vmem:[%s4902_s1 + $0x290] ss:$8 sps:$4 sm:$0xff]  }
  0x7d   : > { %1158 = vmatprep.subr.bf16.mxu0 %v3618_v47  ;;  %v3683_v47 = vld [vmem:[%s4902_s1 + $0x2a4] ss:$8 sps:$4 sm:$0xff]  }
  0x80   : > { %1159 = vmatpush1.bf16.msra.mxu0 %v3616_v48  ;;  %v3780_v48 = vld [vmem:[#allocation2 + $0x90] ss:$8 sps:$4 sm:$0xff]  }
  0x81   : > { %1160 = vmatprep.subr.bf16.mxu0 %v3621_v49  ;;  %v3781_v49 = vld [vmem:[#allocation2 + $0xa4] ss:$8 sps:$4 sm:$0xff]   ;;  %1914 = vmatpush1.bf16.msra.mxu1 %v3780_v48  ;;  %v427_v48 = vld [vmem:[%s4903_s2] sm:$0x3] }
  0x82   : > { %1915 = vmatprep.subr.bf16.mxu1 %v3781_v49 }
  0x84   : > { %1161 = vmatpush1.bf16.msra.mxu0 %v3619_v50  ;;  %v3681_v50 = vld [vmem:[%s4902_s1 + $0x2a0] ss:$8 sps:$4 sm:$0xff]  }
  0x85   : > { %1162 = vmatprep.subr.bf16.mxu0 %v3624_v51  ;;  %v3686_v51 = vld [vmem:[%s4902_s1 + $0x2b4] ss:$8 sps:$4 sm:$0xff]  }
  0x88   : > { %1163 = vmatpush1.bf16.msra.mxu0 %v3622_v52  ;;  %v3783_v52 = vld [vmem:[#allocation2 + $0xa0] ss:$8 sps:$4 sm:$0xff]  }
  0x89   : > { %1164 = vmatprep.subr.bf16.mxu0 %v3627_v53  ;;  %v3784_v53 = vld [vmem:[#allocation2 + $0xb4] ss:$8 sps:$4 sm:$0xff]   ;;  %1916 = vmatpush1.bf16.msra.mxu1 %v3783_v52 }
  0x8a   : > { %1917 = vmatprep.subr.bf16.mxu1 %v3784_v53 }
  0x8c   : > { %1165 = vmatpush1.bf16.msra.mxu0 %v3625_v54  ;;  %v3684_v54 = vld [vmem:[%s4902_s1 + $0x2b0] ss:$8 sps:$4 sm:$0xff]  }
  0x8d   : > { %1166 = vmatprep.subr.bf16.mxu0 %v3630_v55  ;;  %v3689_v55 = vld [vmem:[%s4902_s1 + $0x2c4] ss:$8 sps:$4 sm:$0xff]  }
  0x90   : > { %1167 = vmatpush1.bf16.msra.mxu0 %v3628_v56  ;;  %v3786_v56 = vld [vmem:[#allocation2 + $0xb0] ss:$8 sps:$4 sm:$0xff]  }
  0x91   : > { %1168 = vmatprep.subr.bf16.mxu0 %v3633_v57  ;;  %v3787_v57 = vld [vmem:[#allocation2 + $0xc4] ss:$8 sps:$4 sm:$0xff]   ;;  %1918 = vmatpush1.bf16.msra.mxu1 %v3786_v56 }
  0x92   : > { %1919 = vmatprep.subr.bf16.mxu1 %v3787_v57 }
  0x94   : > { %1169 = vmatpush1.bf16.msra.mxu0 %v3631_v58  ;;  %v3687_v58 = vld [vmem:[%s4902_s1 + $0x2c0] ss:$8 sps:$4 sm:$0xff]  }
  0x95   : > { %1170 = vmatprep.subr.bf16.mxu0 %v3636_v59  ;;  %v3692_v59 = vld [vmem:[%s4902_s1 + $0x2d4] ss:$8 sps:$4 sm:$0xff]   ;;  %1920 = vmatpush1.bf16.msra.mxu1 %v3789_v37 }
  0x96   : > { %v3816_v37 = vld [vmem:[#allocation2 + $0x154] ss:$8 sps:$4 sm:$0xff]  }
  0x98   : > { %1171 = vmatpush1.bf16.msra.mxu0 %v3634_v60  ;;  %v3690_v60 = vld [vmem:[%s4902_s1 + $0x2d0] ss:$8 sps:$4 sm:$0xff]  }
  0x99   : > { %1172 = vmatprep.subr.bf16.mxu0 %v3639_v61  ;;  %v3695_v61 = vld [vmem:[%s4902_s1 + $0x2e4] ss:$8 sps:$4 sm:$0xff]  }
  0x9c   : > { %1173 = vmatpush1.bf16.msra.mxu0 %v3637_v62  ;;  %v3693_v62 = vld [vmem:[%s4902_s1 + $0x2e0] ss:$8 sps:$4 sm:$0xff]  }
  0x9d   : > { %1174 = vmatprep.subr.bf16.mxu0 %v3642_v63  ;;  %v3698_v63 = vld [vmem:[%s4902_s1 + $0x2f4] ss:$8 sps:$4 sm:$0xff]  }
  0xa0   : > { %1175 = vmatpush1.bf16.msra.mxu0 %v3640_v0  ;;  %v3696_v0 = vld [vmem:[%s4902_s1 + $0x2f0] ss:$8 sps:$4 sm:$0xff]  }
  0xa1   : > { %1176 = vmatprep.subr.bf16.mxu0 %v3645_v1  ;;  %v3702_v1 = vld [vmem:[%s4902_s1 + $0x304] ss:$8 sps:$4 sm:$0xff]  }
  0xa4   : > { %1177 = vmatpush1.bf16.msra.mxu0 %v3643_v2  ;;  %v4344_v2 = vld [vmem:[%s4070_s23 + $0x18] sm:$0xff] }
  0xa5   : > { %1178 = vmatprep.subr.bf16.mxu0 %v3648_v3  ;;  %v3138_v3 = vcombine.low %v4241_v6, %v4241_v6  ;;  %v3709_v6 = vld [vmem:[%s4902_s1 + $0x324] ss:$8 sps:$4 sm:$0xff]   ;;  %v3140_v36 = vcombine.low %v4344_v2, %v4344_v2 }
  0xa8   : > { %1179 = vmatpush1.bf16.msra.mxu0 %v3646_v4  ;;  %v3700_v4 = vld [vmem:[%s4902_s1 + $0x300] ss:$8 sps:$4 sm:$0xff]  }
  0xa9   : > { %1189 = vmatprep.subr.bf16.mxu0 %v3652_v5  ;;  %v3141_v5 = vcombine.high %v4344_v2, %v4344_v2 }
  0xab   : > { %1181 = vmatmul.mubr.bf16.vlgmr.msra.gmra.mrb[0].mxu0 %v3136_v7  ;;  %v3706_v7 = vld [vmem:[%s4902_s1 + $0x314] ss:$8 sps:$4 sm:$0xff]  }
  0xac   : > { %1190 = vmatpush1.bf16.msra.mxu0 %v3650_v8  ;;  %1221 = vmatprep.mubr.bf16.mxu0 %v3139_v9  ;;  %v3704_v8 = vld [vmem:[%s4902_s1 + $0x310] ss:$8 sps:$4 sm:$0xff]   ;;  %v3707_v9 = vld [vmem:[%s4902_s1 + $0x320] ss:$8 sps:$4 sm:$0xff]  }
  0xad   : > { %1191 = vmatprep.subr.bf16.mxu0 %v3656_v10  ;;  %v3712_v10 = vld [vmem:[%s4902_s1 + $0x334] ss:$8 sps:$4 sm:$0xff]  }
  0xb0   : > { %1192 = vmatpush1.bf16.msra.mxu0 %v3654_v14  ;;  %v3718_v14 = vld [vmem:[%s4902_s1 + $0x354] ss:$8 sps:$4 sm:$0xff]  }
  0xb1   : > { %1193 = vmatprep.subr.bf16.mxu0 %v3659_v15  ;;  %v3716_v15 = vld [vmem:[%s4902_s1 + $0x350] ss:$8 sps:$4 sm:$0xff]  }
  0xb4   : > { %1194 = vmatpush1.bf16.msra.mxu0 %v3657_v18  ;;  %v3724_v18 = vld [vmem:[%s4902_s1 + $0x374] ss:$8 sps:$4 sm:$0xff]  }
  0xb5   : > { %1195 = vmatprep.subr.bf16.mxu0 %v3662_v19  ;;  %v3722_v19 = vld [vmem:[%s4902_s1 + $0x370] ss:$8 sps:$4 sm:$0xff]  }
  0xb8   : > { %1196 = vmatpush1.bf16.msra.mxu0 %v3660_v22  ;;  %v3730_v22 = vld [vmem:[%s4902_s1 + $0x394] ss:$8 sps:$4 sm:$0xff]  }
  0xb9   : > { %1197 = vmatprep.subr.bf16.mxu0 %v3665_v23  ;;  %v3728_v23 = vld [vmem:[%s4902_s1 + $0x390] ss:$8 sps:$4 sm:$0xff]  }
  0xbc   : > { %1198 = vmatpush1.bf16.msra.mxu0 %v3663_v26  ;;  %v3736_v26 = vld [vmem:[%s4902_s1 + $0x3b4] ss:$8 sps:$4 sm:$0xff]  }
  0xbd   : > { %1199 = vmatprep.subr.bf16.mxu0 %v3668_v27  ;;  %v3734_v27 = vld [vmem:[%s4902_s1 + $0x3b0] ss:$8 sps:$4 sm:$0xff]  }
  0xc0   : > { %1200 = vmatpush1.bf16.msra.mxu0 %v3666_v30  ;;  %v3742_v30 = vld [vmem:[%s4902_s1 + $0x3d4] ss:$8 sps:$4 sm:$0xff]  }
  0xc1   : > { %1201 = vmatprep.subr.bf16.mxu0 %v3671_v31  ;;  %v3740_v31 = vld [vmem:[%s4902_s1 + $0x3d0] ss:$8 sps:$4 sm:$0xff]  }
  0xc4   : > { %1202 = vmatpush1.bf16.msra.mxu0 %v3669_v34  ;;  %v3748_v34 = vld [vmem:[%s4902_s1 + $0x3f4] ss:$8 sps:$4 sm:$0xff]  }
  0xc5   : > { %1203 = vmatprep.subr.bf16.mxu0 %v3674_v35  ;;  %v3746_v35 = vld [vmem:[%s4902_s1 + $0x3f0] ss:$8 sps:$4 sm:$0xff]  }
  0xc8   : > { %1204 = vmatpush1.bf16.msra.mxu0 %v3672_v38  ;;  %v3790_v38 = vld [vmem:[#allocation2 + $0xd4] ss:$8 sps:$4 sm:$0xff]  }
  0xc9   : > { %1205 = vmatprep.subr.bf16.mxu0 %v3677_v39  ;;  %v3792_v39 = vld [vmem:[#allocation2 + $0xd0] ss:$8 sps:$4 sm:$0xff]   ;;  %1921 = vmatprep.subr.bf16.mxu1 %v3790_v38  ;;  %v2055_v38 = vld [vmem:[%s4906_s5 + $0x108] sm:$0xff] }
  0xca   : > { %1922 = vmatpush1.bf16.msra.mxu1 %v3792_v39  ;;  %v2059_v39 = vld [vmem:[%s4906_s5 + $0x128] sm:$0xff] }
  0xcb   : > { %1923 = vmatprep.subr.bf16.mxu1 %v3793_v40  ;;  %v3401_v40 = vcombine.high %v2055_v38, %v2059_v39 }
  0xcc   : > { %1206 = vmatpush1.bf16.msra.mxu0 %v3675_v42  ;;  %v3796_v42 = vld [vmem:[#allocation2 + $0xf4] ss:$8 sps:$4 sm:$0xff]  }
  0xcd   : > { %1207 = vmatprep.subr.bf16.mxu0 %v3680_v43  ;;  %v3798_v43 = vld [vmem:[#allocation2 + $0xf0] ss:$8 sps:$4 sm:$0xff]  }
  0xce   : > { %1924 = vmatpush1.bf16.msra.mxu1 %v3795_v41  ;;  %v3814_v41 = vld [vmem:[#allocation2 + $0x150] ss:$8 sps:$4 sm:$0xff]  }
  0xcf   : > { %1925 = vmatprep.subr.bf16.mxu1 %v3796_v42  ;;  %v3400_v42 = vcombine.low %v2055_v38, %v2059_v39  ;;  %v3846_v39 = vld [vmem:[#allocation2 + $0x1f4] ss:$8 sps:$4 sm:$0xff]  }
  0xd0   : > { %1208 = vmatpush1.bf16.msra.mxu0 %v3678_v46  ;;  %v4445_v46 = vshrl.u32 %v429_v45, 7  ;;  %v2067_v45 = vld [vmem:[%s4906_s5 + $0x168] sm:$0xff] }
  0xd1   : > { %1209 = vmatprep.subr.bf16.mxu0 %v3683_v47 }
  0xd2   : > { %1926 = vmatpush1.bf16.msra.mxu1 %v3798_v43  ;;  %v4448_v47 = vsub.s32 0, %v4445_v46  ;;  %v4454_v49 = vsub.s32 1, %v4445_v46  ;;  %v3819_v43 = vld [vmem:[#allocation2 + $0x164] ss:$8 sps:$4 sm:$0xff]  }
  0xd3   : > { %1936 = vmatprep.subr.bf16.mxu1 %v3801_v44  ;;  %v2063_v44 = vld [vmem:[%s4906_s5 + $0x148] sm:$0xff] }
  0xd4   : > { %1210 = vmatpush1.bf16.msra.mxu0 %v3681_v50  ;;  %v432_v50 = vrot.slane %v427_v48, %v4448_v47 }
  0xd5   : > { %1211 = vmatprep.subr.bf16.mxu0 %v3686_v51  ;;  %v436_v51 = vrot.slane %v427_v48, %v4454_v49  ;;  %v3409_v48 = vcombine.high %v2063_v44, %v2067_v45 }
  0xd8   : > { %1212 = vmatpush1.bf16.msra.mxu0 %v3684_v54 }
  0xd9   : > { %1213 = vmatprep.subr.bf16.mxu0 %v3689_v55 }
  0xdc   : > { %1214 = vmatpush1.bf16.msra.mxu0 %v3687_v58 }
  0xdd   : > { %1215 = vmatprep.subr.bf16.mxu0 %v3692_v59 }
  0xe0   : > { %1216 = vmatpush1.bf16.msra.mxu0 %v3690_v60 }
  0xe1   : > { %1217 = vmatprep.subr.bf16.mxu0 %v3695_v61 }
  0xe4   : > { %1218 = vmatpush1.bf16.msra.mxu0 %v3693_v62 }
  0xe5   : > { %1219 = vmatprep.subr.bf16.mxu0 %v3698_v63 }
  0xe8   : > { %1220 = vmatpush1.bf16.msra.mxu0 %v3696_v0 }
  0xe9   : > { %1230 = vmatprep.subr.bf16.mxu0 %v3702_v1 }
  0xeb   : > { %1222 = vmatmul.mubr.bf16.vlgmr.msra.gmra.mrb[0].mxu0 %v3138_v3 }
  0xec   : > { %1231 = vmatpush1.bf16.msra.mxu0 %v3700_v4  ;;  %1262 = vmatprep.mubr.bf16.mxu0 %v3141_v5 }
  0xed   : > { %1232 = vmatprep.subr.bf16.mxu0 %v3706_v7 }
  0xf0   : > { %1233 = vmatpush1.bf16.msra.mxu0 %v3704_v8 }
  0xf1   : > { %1234 = vmatprep.subr.bf16.mxu0 %v3709_v6 }
  0xf4   : > { %1235 = vmatpush1.bf16.msra.mxu0 %v3707_v9 }
  0xf5   : > { %1236 = vmatprep.subr.bf16.mxu0 %v3712_v10  ;;  %v3799_v10 = vld [vmem:[#allocation2 + $0x100] ss:$8 sps:$4 sm:$0xff]  }
  0xf8   : > { %1237 = vmatpush1.bf16.msra.mxu0 %v3710_v11 }
  0xf9   : > { %1238 = vmatprep.subr.bf16.mxu0 %v3715_v12  ;;  %v3804_v12 = vld [vmem:[#allocation2 + $0x114] ss:$8 sps:$4 sm:$0xff]  }
  0xfc   : > { %1239 = vmatpush1.bf16.msra.mxu0 %v3713_v13 }
  0xfd   : > { %1240 = vmatprep.subr.bf16.mxu0 %v3718_v14  ;;  %v2023_v14 = vld [vmem:[%s4906_s5 + $0x8] sm:$0xff] }
 0x100   : > { %1241 = vmatpush1.bf16.msra.mxu0 %v3716_v15  ;;  %v3802_v15 = vld [vmem:[#allocation2 + $0x110] ss:$8 sps:$4 sm:$0xff]  }
 0x101   : > { %1242 = vmatprep.subr.bf16.mxu0 %v3721_v16  ;;  %v2027_v16 = vld [vmem:[%s4906_s5 + $0x28] sm:$0xff] }
 0x104   : > { %1243 = vmatpush1.bf16.msra.mxu0 %v3719_v17  ;;  %v3807_v17 = vld [vmem:[#allocation2 + $0x124] ss:$8 sps:$4 sm:$0xff]  }
 0x105   : > { %1244 = vmatprep.subr.bf16.mxu0 %v3724_v18  ;;  %v3368_v18 = vcombine.low %v2023_v14, %v2027_v16 }
 0x108   : > { %1245 = vmatpush1.bf16.msra.mxu0 %v3722_v19  ;;  %v3369_v19 = vcombine.high %v2023_v14, %v2027_v16  ;;  %v2103_v16 = vld [vmem:[%s4906_s5 + $0x288] sm:$0xff] }
 0x109   : > { %1246 = vmatprep.subr.bf16.mxu0 %v3727_v20  ;;  %v2031_v20 = vld [vmem:[%s4906_s5 + $0x48] sm:$0xff] }
 0x10c   : > { %1247 = vmatpush1.bf16.msra.mxu0 %v3725_v21  ;;  %v2035_v21 = vld [vmem:[%s4906_s5 + $0x68] sm:$0xff] }
 0x10d   : > { %1248 = vmatprep.subr.bf16.mxu0 %v3730_v22  ;;  %v3377_v22 = vcombine.high %v2031_v20, %v2035_v21 }
 0x110   : > { %1249 = vmatpush1.bf16.msra.mxu0 %v3728_v23  ;;  %v3805_v23 = vld [vmem:[#allocation2 + $0x120] ss:$8 sps:$4 sm:$0xff]  }
 0x111   : > { %1250 = vmatprep.subr.bf16.mxu0 %v3733_v24  ;;  %v3376_v24 = vcombine.low %v2031_v20, %v2035_v21  ;;  %v3837_v21 = vld [vmem:[#allocation2 + $0x1c4] ss:$8 sps:$4 sm:$0xff]  }
 0x114   : > { %1251 = vmatpush1.bf16.msra.mxu0 %v3731_v25  ;;  %v3810_v25 = vld [vmem:[#allocation2 + $0x134] ss:$8 sps:$4 sm:$0xff]  }
 0x115   : > { %1252 = vmatprep.subr.bf16.mxu0 %v3736_v26  ;;  %v2039_v26 = vld [vmem:[%s4906_s5 + $0x88] sm:$0xff] }
 0x118   : > { %1253 = vmatpush1.bf16.msra.mxu0 %v3734_v27  ;;  %v2043_v27 = vld [vmem:[%s4906_s5 + $0xa8] sm:$0xff] }
 0x119   : > { %1254 = vmatprep.subr.bf16.mxu0 %v3739_v28  ;;  %v3385_v28 = vcombine.high %v2039_v26, %v2043_v27 }
 0x11c   : > { %1255 = vmatpush1.bf16.msra.mxu0 %v3737_v29  ;;  %v3808_v29 = vld [vmem:[#allocation2 + $0x130] ss:$8 sps:$4 sm:$0xff]  }
 0x11d   : > { %1256 = vmatprep.subr.bf16.mxu0 %v3742_v30  ;;  %v3384_v30 = vcombine.low %v2039_v26, %v2043_v27  ;;  %v3840_v27 = vld [vmem:[#allocation2 + $0x1d4] ss:$8 sps:$4 sm:$0xff]  }
 0x120   : > { %1257 = vmatpush1.bf16.msra.mxu0 %v3740_v31  ;;  %v3813_v31 = vld [vmem:[#allocation2 + $0x144] ss:$8 sps:$4 sm:$0xff]  }
 0x121   : > { %1258 = vmatprep.subr.bf16.mxu0 %v3745_v32  ;;  %v2047_v32 = vld [vmem:[%s4906_s5 + $0xc8] sm:$0xff] }
 0x124   : > { %1259 = vmatpush1.bf16.msra.mxu0 %v3743_v33  ;;  %v2051_v33 = vld [vmem:[%s4906_s5 + $0xe8] sm:$0xff] }
 0x125   : > { %1260 = vmatprep.subr.bf16.mxu0 %v3748_v34  ;;  %v3393_v34 = vcombine.high %v2047_v32, %v2051_v33 }
 0x128   : > { %1261 = vmatpush1.bf16.msra.mxu0 %v3746_v35  ;;  %v3811_v35 = vld [vmem:[#allocation2 + $0x140] ss:$8 sps:$4 sm:$0xff]  }
 0x129   : > { %2873 = vmatprep.subr.bf16.mxu0 %v3369_v19  ;;  %v3832_v19 = vld [vmem:[#allocation2 + $0x1b0] ss:$8 sps:$4 sm:$0xff]  }
 0x12b   : > { %1263 = vmatmul.mubr.bf16.vlgmr.msra.gmra.mrb[0].mxu0 %v3140_v36  ;;  %v3392_v36 = vcombine.low %v2047_v32, %v2051_v33  ;;  %v3843_v33 = vld [vmem:[#allocation2 + $0x1e4] ss:$8 sps:$4 sm:$0xff]  }
 0x12c   : > { %2874 = vmatpush1.bf16.msra.mxu0 %v3368_v18 }
 0x12d   : > { %2875 = vmatprep.subr.bf16.mxu0 %v3377_v22  ;;  %v2111_v22 = vld [vmem:[%s4906_s5 + $0x2c8] sm:$0xff] }
 0x130   : > { %2876 = vmatpush1.bf16.msra.mxu0 %v3376_v24 }
 0x131   : > { %2877 = vmatprep.subr.bf16.mxu0 %v3385_v28  ;;  %v2119_v28 = vld [vmem:[%s4906_s5 + $0x308] sm:$0xff] }
 0x134   : > { %2878 = vmatpush1.bf16.msra.mxu0 %v3384_v30 }
 0x135   : > { %2879 = vmatprep.subr.bf16.mxu0 %v3393_v34  ;;  %v2127_v34 = vld [vmem:[%s4906_s5 + $0x348] sm:$0xff] }
 0x138   : > { %2880 = vmatpush1.bf16.msra.mxu0 %v3392_v36 }
 0x139   : > { %2881 = vmatprep.subr.bf16.mxu0 %v3401_v40  ;;  %v3844_v40 = vld [vmem:[#allocation2 + $0x1f0] ss:$8 sps:$4 sm:$0xff]  }
 0x13c   : > { %2882 = vmatpush1.bf16.msra.mxu0 %v3400_v42  ;;  %v3847_v42 = vld [vmem:[#allocation2 + $0x200] ss:$8 sps:$4 sm:$0xff]  }
 0x13d   : > { %2883 = vmatprep.subr.bf16.mxu0 %v3409_v48  ;;  %v3850_v48 = vld [vmem:[#allocation2 + $0x210] ss:$8 sps:$4 sm:$0xff]  }
 0x1fe   : > { %v1264_v52 = vpop.f32.mrb[0].mxu0 }
 0x1ff   : > { %v3506_v53 = vadd.f32 %v1264_v52, %v432_v50  ;;  %v1266_v54 = vpop.f32.mrb[1].mxu0  ;;  %v3817_v50 = vld [vmem:[#allocation2 + $0x160] ss:$8 sps:$4 sm:$0xff]   ;;  %v3822_v52 = vld [vmem:[#allocation2 + $0x174] ss:$8 sps:$4 sm:$0xff]  }
 0x200   : > { %v3507_v55 = vadd.f32 %v1266_v54, %v436_v51  ;;  %v1268_v56 = vpop.f32.mrb[2].mxu0  ;;  %v3408_v51 = vcombine.low %v2063_v44, %v2067_v45  ;;  %v2075_v54 = vld [vmem:[%s4906_s5 + $0x1a8] sm:$0xff]  ;;  %v3852_v44 = vld [vmem:[#allocation2 + $0x214] ss:$8 sps:$4 sm:$0xff]  }
 0x201   : > { %v1271_v57 = vmax.f32 %v3506_v53, 0.0  ;;  %v1269_v58 = vpop.f32.mrb[3].mxu0  ;;  %v2071_v53 = vld [vmem:[%s4906_s5 + $0x188] sm:$0xff]  ;;  %v3820_v56 = vld [vmem:[#allocation2 + $0x170] ss:$8 sps:$4 sm:$0xff]  }
 0x202   : > { %v1272_v59 = vmax.f32 %v3507_v55, 0.0  ;;  %v3417_v55 = vcombine.high %v2071_v53, %v2075_v54  ;;  %2884 = vmatpush1.bf16.msra.mxu0 %v3408_v51  ;;  %v3825_v58 = vld [vmem:[#allocation2 + $0x184] ss:$8 sps:$4 sm:$0xff]   ;;  %v3853_v51 = vld [vmem:[#allocation2 + $0x220] ss:$8 sps:$4 sm:$0xff]  }
 0x203   : > { %v4458_v60 = vpack.c.bf16 %v1271_v57, %v1271_v57  ;;  %v3416_v57 = vcombine.low %v2071_v53, %v2075_v54  ;;  %v3856_v53 = vld [vmem:[#allocation2 + $0x230] ss:$8 sps:$4 sm:$0xff]   ;;  %v3861_v54 = vld [vmem:[#allocation2 + $0x244] ss:$8 sps:$4 sm:$0xff]  }
 0x204   : > { %v1274_v61 = vpack.c.bf16 %v1272_v59, %v1272_v59  ;;  %2885 = vmatprep.subr.bf16.mxu0 %v3417_v55  ;;  %v2079_v59 = vld [vmem:[%s4906_s5 + $0x1c8] sm:$0xff] }
 0x205   : > { %v1276_v62 = vshrl.u32 %v4458_v60, 16  ;;  %v1279_v63 = vshll.u32 %v4458_v60, 16  ;;  %v3859_v55 = vld [vmem:[#allocation2 + $0x240] ss:$8 sps:$4 sm:$0xff]  }
 0x206   : > { %v1283_v0 = vshrl.u32 %v1274_v61, 16  ;;  %v1286_v1 = vshll.u32 %v1274_v61, 16  ;;  %2886 = vmatpush1.bf16.msra.mxu0 %v3416_v57  ;;  %v3865_v57 = vld [vmem:[#allocation2 + $0x260] ss:$8 sps:$4 sm:$0xff]  }
 0x207   : > { %v1278_v2 = vrot.slane %v1276_v62, 7  ;;  %v1296_v3 = vrot.slane %v1279_v63, 1 }
 0x208   : > { %v1285_v4 = vrot.slane %v1283_v0, 7  ;;  %v1298_v5 = vrot.slane %v1286_v1, 1 }
 0x209   : > { %v1281_v7 = vor.u32 %v1279_v63, %v1278_v2  ;;  %v4462_v8 = vor.u32 %v1296_v3, %v1276_v62  ;;  %v3823_v63 = vld [vmem:[#allocation2 + $0x180] ss:$8 sps:$4 sm:$0xff]  }
 0x20a   : > { %v1288_v6 = vor.u32 %v1286_v1, %v1285_v4  ;;  %v4464_v9 = vor.u32 %v1298_v5, %v1283_v0  ;;  %v3828_v1 = vld [vmem:[#allocation2 + $0x194] ss:$8 sps:$4 sm:$0xff]   ;;  %v2087_v2 = vld [vmem:[%s4906_s5 + $0x208] sm:$0xff]  ;;  %v3826_v5 = vld [vmem:[#allocation2 + $0x190] ss:$8 sps:$4 sm:$0xff]  }
 0x20b   : > { %v1294_v13 = vsel %vm1293_vm2, 0, %v1281_v7  ;;  %v2091_v3 = vld [vmem:[%s4906_s5 + $0x228] sm:$0xff] }
 0x20c   : > { %v1295_v11 = vsel %vm1293_vm2, 0, %v1288_v6  ;;  %v3433_v4 = vcombine.high %v2087_v2, %v2091_v3  ;;  %v3432_v7 = vcombine.low %v2087_v2, %v2091_v3  ;;  %v3831_v6 = vld [vmem:[#allocation2 + $0x1a4] ss:$8 sps:$4 sm:$0xff]   ;;  %v1306_v45 = vsel %vm4550_vm5, %v4464_v9, 0  ;;  %v3877_v2 = vld [vmem:[#allocation2 + $0x2a0] ss:$8 sps:$4 sm:$0xff]  }
 0x20d   : > { %1927 = vmatprep.mubr.bf16.mxu1 %v1295_v11  ;;  %v2099_v11 = vld [vmem:[%s4906_s5 + $0x268] sm:$0xff]  ;;  %v3882_v3 = vld [vmem:[#allocation2 + $0x2b4] ss:$8 sps:$4 sm:$0xff]  }
 0x20e   : > { %1928 = vmatmul.mubr.bf16.vlgmr.msra.gmra.mrb[0].mxu1 %v1294_v13  ;;  %v3829_v13 = vld [vmem:[#allocation2 + $0x1a0] ss:$8 sps:$4 sm:$0xff]   ;;  %v3867_v9 = vld [vmem:[#allocation2 + $0x264] ss:$8 sps:$4 sm:$0xff]  }
 0x20f   : > { %1937 = vmatpush1.bf16.msra.mxu1 %v3799_v10  ;;  %1968 = vmatprep.mubr.bf16.mxu1 %v1274_v61  ;;  %v2083_v61 = vld [vmem:[%s4906_s5 + $0x1e8] sm:$0xff] }
 0x210   : > { %1938 = vmatprep.subr.bf16.mxu1 %v3804_v12  ;;  %v3425_v62 = vcombine.high %v2079_v59, %v2083_v61  ;;  %v3424_v0 = vcombine.low %v2079_v59, %v2083_v61  ;;  %v2095_v10 = vld [vmem:[%s4906_s5 + $0x248] sm:$0xff]  ;;  %v3868_v59 = vld [vmem:[#allocation2 + $0x270] ss:$8 sps:$4 sm:$0xff]  }
 0x211   : > { %v3441_v12 = vcombine.high %v2095_v10, %v2099_v11  ;;  %v3440_v14 = vcombine.low %v2095_v10, %v2099_v11  ;;  %v3873_v61 = vld [vmem:[#allocation2 + $0x284] ss:$8 sps:$4 sm:$0xff]   ;;  %v3886_v10 = vld [vmem:[#allocation2 + $0x2d0] ss:$8 sps:$4 sm:$0xff]  }
 0x212   : > { %2887 = vmatprep.subr.bf16.mxu0 %v3425_v62  ;;  %v3871_v62 = vld [vmem:[#allocation2 + $0x280] ss:$8 sps:$4 sm:$0xff]   ;;  %v3891_v11 = vld [vmem:[#allocation2 + $0x2e4] ss:$8 sps:$4 sm:$0xff]  }
 0x213   : > { %1939 = vmatpush1.bf16.msra.mxu1 %v3802_v15  ;;  %2888 = vmatpush1.bf16.msra.mxu0 %v3424_v0  ;;  %v3834_v15 = vld [vmem:[#allocation2 + $0x1b4] ss:$8 sps:$4 sm:$0xff]   ;;  %v3874_v0 = vld [vmem:[#allocation2 + $0x290] ss:$8 sps:$4 sm:$0xff]  }
 0x214   : > { %1940 = vmatprep.subr.bf16.mxu1 %v3807_v17  ;;  %2889 = vmatprep.subr.bf16.mxu0 %v3433_v4  ;;  %v2107_v17 = vld [vmem:[%s4906_s5 + $0x2a8] sm:$0xff]  ;;  %v3880_v4 = vld [vmem:[#allocation2 + $0x2b0] ss:$8 sps:$4 sm:$0xff]  }
 0x215   : > { %v3449_v18 = vcombine.high %v2103_v16, %v2107_v17  ;;  %v3448_v20 = vcombine.low %v2103_v16, %v2107_v17  ;;  %v3892_v16 = vld [vmem:[#allocation2 + $0x2f0] ss:$8 sps:$4 sm:$0xff]  }
 0x217   : > { %1941 = vmatpush1.bf16.msra.mxu1 %v3805_v23  ;;  %2890 = vmatpush1.bf16.msra.mxu0 %v3432_v7  ;;  %v2115_v23 = vld [vmem:[%s4906_s5 + $0x2e8] sm:$0xff] }
 0x218   : > { %1942 = vmatprep.subr.bf16.mxu1 %v3810_v25  ;;  %2891 = vmatprep.subr.bf16.mxu0 %v3441_v12  ;;  %v3457_v24 = vcombine.high %v2111_v22, %v2115_v23  ;;  %v3835_v25 = vld [vmem:[#allocation2 + $0x1c0] ss:$8 sps:$4 sm:$0xff]   ;;  %v3456_v26 = vcombine.low %v2111_v22, %v2115_v23  ;;  %v1305_v22 = vsel %vm4550_vm5, %v4462_v8, 0 }
 0x219   : > { %v3883_v7 = vld [vmem:[#allocation2 + $0x2c0] ss:$8 sps:$4 sm:$0xff]  }
 0x21a   : > { %v3889_v12 = vld [vmem:[#allocation2 + $0x2e0] ss:$8 sps:$4 sm:$0xff]  }
 0x21b   : > { %1943 = vmatpush1.bf16.msra.mxu1 %v3808_v29  ;;  %2892 = vmatpush1.bf16.msra.mxu0 %v3440_v14  ;;  %v2123_v29 = vld [vmem:[%s4906_s5 + $0x328] sm:$0xff]  ;;  %v2022_v14 = vld [vmem:[%s4906_s5] sm:$0xff] }
 0x21c   : > { %1944 = vmatprep.subr.bf16.mxu1 %v3813_v31  ;;  %2893 = vmatprep.subr.bf16.mxu0 %v3449_v18  ;;  %v3465_v30 = vcombine.high %v2119_v28, %v2123_v29  ;;  %v3838_v31 = vld [vmem:[#allocation2 + $0x1d0] ss:$8 sps:$4 sm:$0xff]   ;;  %v3464_v32 = vcombine.low %v2119_v28, %v2123_v29  ;;  %v2030_v18 = vld [vmem:[%s4906_s5 + $0x40] sm:$0xff] }
 0x21d   : > { %v2038_v23 = vld [vmem:[%s4906_s5 + $0x80] sm:$0xff] }
 0x21e   : > { %v2050_v8 = vld [vmem:[%s4906_s5 + $0xe0] sm:$0xff] }
 0x21f   : > { %1945 = vmatpush1.bf16.msra.mxu1 %v3811_v35  ;;  %2894 = vmatpush1.bf16.msra.mxu0 %v3448_v20  ;;  %v2131_v35 = vld [vmem:[%s4906_s5 + $0x368] sm:$0xff] }
 0x220   : > { %1946 = vmatprep.subr.bf16.mxu1 %v3816_v37  ;;  %2895 = vmatprep.subr.bf16.mxu0 %v3457_v24  ;;  %v3473_v36 = vcombine.high %v2127_v34, %v2131_v35  ;;  %v3841_v37 = vld [vmem:[#allocation2 + $0x1e0] ss:$8 sps:$4 sm:$0xff]   ;;  %v3472_v38 = vcombine.low %v2127_v34, %v2131_v35 }
 0x221   : > { %v2042_v24 = vld [vmem:[%s4906_s5 + $0xa0] sm:$0xff] }
 0x222   : > { %v3382_v28 = vcombine.low %v2038_v23, %v2042_v24  ;;  %v2062_v34 = vld [vmem:[%s4906_s5 + $0x140] sm:$0xff] }
 0x223   : > { %1947 = vmatpush1.bf16.msra.mxu1 %v3814_v41  ;;  %2896 = vmatpush1.bf16.msra.mxu0 %v3456_v26  ;;  %v3849_v41 = vld [vmem:[#allocation2 + $0x204] ss:$8 sps:$4 sm:$0xff]   ;;  %v3383_v26 = vcombine.high %v2038_v23, %v2042_v24 }
 0x224   : > { %1948 = vmatprep.subr.bf16.mxu1 %v3819_v43  ;;  %2897 = vmatprep.subr.bf16.mxu0 %v3465_v30  ;;  %v2054_v30 = vld [vmem:[%s4906_s5 + $0x100] sm:$0xff]  ;;  %v2147_v23 = vld [vmem:[%s4906_s5 + $0x3e8] sm:$0xff] }
 0x225   : > { %v2066_v35 = vld [vmem:[%s4906_s5 + $0x160] sm:$0xff] }
 0x226   : > { %v2082_v43 = vld [vmem:[%s4906_s5 + $0x1e0] sm:$0xff] }
 0x227   : > { %1949 = vmatpush1.bf16.msra.mxu1 %v3817_v50  ;;  %2898 = vmatpush1.bf16.msra.mxu0 %v3464_v32  ;;  %v3855_v50 = vld [vmem:[#allocation2 + $0x224] ss:$8 sps:$4 sm:$0xff]  }
 0x228   : > { %1950 = vmatprep.subr.bf16.mxu1 %v3822_v52  ;;  %2899 = vmatprep.subr.bf16.mxu0 %v3473_v36  ;;  %v3858_v52 = vld [vmem:[#allocation2 + $0x234] ss:$8 sps:$4 sm:$0xff]  }
 0x22b   : > { %1951 = vmatpush1.bf16.msra.mxu1 %v3820_v56  ;;  %2900 = vmatpush1.bf16.msra.mxu0 %v3472_v38  ;;  %v3862_v56 = vld [vmem:[#allocation2 + $0x250] ss:$8 sps:$4 sm:$0xff]   ;;  %v2070_v38 = vld [vmem:[%s4906_s5 + $0x180] sm:$0xff] }
 0x22c   : > { %1952 = vmatprep.subr.bf16.mxu1 %v3825_v58  ;;  %v3870_v58 = vld [vmem:[#allocation2 + $0x274] ss:$8 sps:$4 sm:$0xff]  }
 0x22f   : > { %1953 = vmatpush1.bf16.msra.mxu1 %v3823_v63  ;;  %v3876_v63 = vld [vmem:[#allocation2 + $0x294] ss:$8 sps:$4 sm:$0xff]  }
 0x230   : > { %1954 = vmatprep.subr.bf16.mxu1 %v3828_v1  ;;  %v3879_v1 = vld [vmem:[#allocation2 + $0x2a4] ss:$8 sps:$4 sm:$0xff]  }
 0x233   : > { %1955 = vmatpush1.bf16.msra.mxu1 %v3826_v5  ;;  %v3885_v5 = vld [vmem:[#allocation2 + $0x2c4] ss:$8 sps:$4 sm:$0xff]  }
 0x234   : > { %1956 = vmatprep.subr.bf16.mxu1 %v3831_v6  ;;  %v3888_v6 = vld [vmem:[#allocation2 + $0x2d4] ss:$8 sps:$4 sm:$0xff]  }
 0x237   : > { %1957 = vmatpush1.bf16.msra.mxu1 %v3829_v13  ;;  %v3894_v13 = vld [vmem:[#allocation2 + $0x2f4] ss:$8 sps:$4 sm:$0xff]  }
 0x238   : > { %1958 = vmatprep.subr.bf16.mxu1 %v3834_v15  ;;  %v2026_v15 = vld [vmem:[%s4906_s5 + $0x20] sm:$0xff] }
 0x239   : > { %v3367_v17 = vcombine.high %v2022_v14, %v2026_v15  ;;  %v3366_v20 = vcombine.low %v2022_v14, %v2026_v15  ;;  %v2139_v15 = vld [vmem:[%s4906_s5 + $0x3a8] sm:$0xff] }
 0x23b   : > { %1959 = vmatpush1.bf16.msra.mxu1 %v3832_v19  ;;  %v2034_v19 = vld [vmem:[%s4906_s5 + $0x60] sm:$0xff] }
 0x23c   : > { %1960 = vmatprep.subr.bf16.mxu1 %v3837_v21  ;;  %v3375_v21 = vcombine.high %v2030_v18, %v2034_v19 }
 0x23f   : > { %1961 = vmatpush1.bf16.msra.mxu1 %v3835_v25  ;;  %v3374_v25 = vcombine.low %v2030_v18, %v2034_v19  ;;  %v2142_v19 = vld [vmem:[%s4906_s5 + $0x3c0] sm:$0xff] }
 0x240   : > { %1962 = vmatprep.subr.bf16.mxu1 %v3840_v27  ;;  %v2046_v27 = vld [vmem:[%s4906_s5 + $0xc0] sm:$0xff] }
 0x241   : > { %v3391_v29 = vcombine.high %v2046_v27, %v2050_v8  ;;  %v3390_v32 = vcombine.low %v2046_v27, %v2050_v8  ;;  %v2024_v27 = vld [vmem:[%s4906_s5 + $0x10] sm:$0xff] }
 0x242   : > { %v2028_v8 = vld [vmem:[%s4906_s5 + $0x30] sm:$0xff] }
 0x243   : > { %1963 = vmatpush1.bf16.msra.mxu1 %v3838_v31  ;;  %v2058_v31 = vld [vmem:[%s4906_s5 + $0x120] sm:$0xff] }
 0x244   : > { %1964 = vmatprep.subr.bf16.mxu1 %v3843_v33  ;;  %v3399_v33 = vcombine.high %v2054_v30, %v2058_v31  ;;  %v3398_v36 = vcombine.low %v2054_v30, %v2058_v31  ;;  %v2029_v30 = vld [vmem:[%s4906_s5 + $0x38] sm:$0xff]  ;;  %v3370_v31 = vcombine.low %v2024_v27, %v2028_v8 }
 0x247   : > { %1965 = vmatpush1.bf16.msra.mxu1 %v3841_v37  ;;  %v3407_v37 = vcombine.high %v2062_v34, %v2066_v35 }
 0x248   : > { %1966 = vmatprep.subr.bf16.mxu1 %v3846_v39  ;;  %v2074_v39 = vld [vmem:[%s4906_s5 + $0x1a0] sm:$0xff] }
 0x24b   : > { %1967 = vmatpush1.bf16.msra.mxu1 %v3844_v40  ;;  %v3406_v40 = vcombine.low %v2062_v34, %v2066_v35  ;;  %v1403_v34 = vld [vmem:[%s4905_s4] sm:$0x3] }
 0x24c   : > { %1977 = vmatprep.subr.bf16.mxu1 %v3849_v41  ;;  %v3415_v41 = vcombine.high %v2070_v38, %v2074_v39  ;;  %v1408_v35 = vrot.slane %v1403_v34, %v4448_v47 }
 0x24e   : > { %1969 = vmatmul.mubr.bf16.vlgmr.msra.gmra.mrb[0].mxu1 %v4458_v60  ;;  %v3864_v60 = vld [vmem:[#allocation2 + $0x254] ss:$8 sps:$4 sm:$0xff]  }
 0x24f   : > { %1978 = vmatpush1.bf16.msra.mxu1 %v3847_v42  ;;  %2009 = vmatprep.mubr.bf16.mxu1 %v1306_v45  ;;  %v2078_v42 = vld [vmem:[%s4906_s5 + $0x1c0] sm:$0xff] }
 0x250   : > { %1979 = vmatprep.subr.bf16.mxu1 %v3852_v44  ;;  %v3414_v44 = vcombine.low %v2070_v38, %v2074_v39  ;;  %v3423_v45 = vcombine.high %v2078_v42, %v2082_v43 }
 0x253   : > { %1980 = vmatpush1.bf16.msra.mxu1 %v3850_v48  ;;  %v2086_v48 = vld [vmem:[%s4906_s5 + $0x200] sm:$0xff] }
 0x254   : > { %1981 = vmatprep.subr.bf16.mxu1 %v3855_v50  ;;  %v2090_v50 = vld [vmem:[%s4906_s5 + $0x220] sm:$0xff] }
 0x257   : > { %1982 = vmatpush1.bf16.msra.mxu1 %v3853_v51  ;;  %v3422_v51 = vcombine.low %v2078_v42, %v2082_v43 }
 0x258   : > { %1983 = vmatprep.subr.bf16.mxu1 %v3858_v52  ;;  %v3431_v52 = vcombine.high %v2086_v48, %v2090_v50 }
 0x25b   : > { %1984 = vmatpush1.bf16.msra.mxu1 %v3856_v53  ;;  %v2094_v53 = vld [vmem:[%s4906_s5 + $0x240] sm:$0xff] }
 0x25c   : > { %1985 = vmatprep.subr.bf16.mxu1 %v3861_v54  ;;  %v2098_v54 = vld [vmem:[%s4906_s5 + $0x260] sm:$0xff] }
 0x25f   : > { %1986 = vmatpush1.bf16.msra.mxu1 %v3859_v55  ;;  %v3430_v55 = vcombine.low %v2086_v48, %v2090_v50  ;;  %v2036_v48 = vld [vmem:[%s4906_s5 + $0x70] sm:$0xff]  ;;  %v2033_v50 = vld [vmem:[%s4906_s5 + $0x58] sm:$0xff] }
 0x260   : > { %1987 = vmatprep.subr.bf16.mxu1 %v3864_v60  ;;  %v3439_v60 = vcombine.high %v2094_v53, %v2098_v54 }
 0x263   : > { %1988 = vmatpush1.bf16.msra.mxu1 %v3862_v56  ;;  %v2102_v56 = vld [vmem:[%s4906_s5 + $0x280] sm:$0xff] }
 0x264   : > { %1989 = vmatprep.subr.bf16.mxu1 %v3867_v9  ;;  %v2106_v9 = vld [vmem:[%s4906_s5 + $0x2a0] sm:$0xff] }
 0x267   : > { %1990 = vmatpush1.bf16.msra.mxu1 %v3865_v57  ;;  %v3438_v57 = vcombine.low %v2094_v53, %v2098_v54  ;;  %v2040_v54 = vld [vmem:[%s4906_s5 + $0x90] sm:$0xff] }
 0x268   : > { %1991 = vmatprep.subr.bf16.mxu1 %v3870_v58  ;;  %v3447_v58 = vcombine.high %v2102_v56, %v2106_v9 }
 0x26b   : > { %1992 = vmatpush1.bf16.msra.mxu1 %v3868_v59  ;;  %v2110_v59 = vld [vmem:[%s4906_s5 + $0x2c0] sm:$0xff] }
 0x26c   : > { %1993 = vmatprep.subr.bf16.mxu1 %v3873_v61  ;;  %v2114_v61 = vld [vmem:[%s4906_s5 + $0x2e0] sm:$0xff] }
 0x26f   : > { %1994 = vmatpush1.bf16.msra.mxu1 %v3871_v62  ;;  %v3446_v62 = vcombine.low %v2102_v56, %v2106_v9  ;;  %v2044_v56 = vld [vmem:[%s4906_s5 + $0xb0] sm:$0xff]  ;;  %v2041_v9 = vld [vmem:[%s4906_s5 + $0x98] sm:$0xff] }
 0x270   : > { %1995 = vmatprep.subr.bf16.mxu1 %v3876_v63  ;;  %v3455_v63 = vcombine.high %v2110_v59, %v2114_v61 }
 0x273   : > { %1996 = vmatpush1.bf16.msra.mxu1 %v3874_v0  ;;  %v2118_v0 = vld [vmem:[%s4906_s5 + $0x300] sm:$0xff] }
 0x274   : > { %1997 = vmatprep.subr.bf16.mxu1 %v3879_v1  ;;  %v2122_v1 = vld [vmem:[%s4906_s5 + $0x320] sm:$0xff] }
 0x277   : > { %1998 = vmatpush1.bf16.msra.mxu1 %v3877_v2  ;;  %v3454_v2 = vcombine.low %v2110_v59, %v2114_v61  ;;  %v3387_v61 = vcombine.high %v2040_v54, %v2044_v56 }
 0x278   : > { %1999 = vmatprep.subr.bf16.mxu1 %v3882_v3  ;;  %v3463_v3 = vcombine.high %v2118_v0, %v2122_v1 }
 0x27b   : > { %2000 = vmatpush1.bf16.msra.mxu1 %v3880_v4  ;;  %v2126_v4 = vld [vmem:[%s4906_s5 + $0x340] sm:$0xff] }
 0x27c   : > { %2001 = vmatprep.subr.bf16.mxu1 %v3885_v5  ;;  %v2130_v5 = vld [vmem:[%s4906_s5 + $0x360] sm:$0xff] }
 0x27f   : > { %2002 = vmatpush1.bf16.msra.mxu1 %v3883_v7  ;;  %v3462_v7 = vcombine.low %v2118_v0, %v2122_v1  ;;  %v2052_v0 = vld [vmem:[%s4906_s5 + $0xf0] sm:$0xff]  ;;  %v2049_v1 = vld [vmem:[%s4906_s5 + $0xd8] sm:$0xff] }
 0x280   : > { %2003 = vmatprep.subr.bf16.mxu1 %v3888_v6  ;;  %v3471_v6 = vcombine.high %v2126_v4, %v2130_v5 }
 0x283   : > { %2004 = vmatpush1.bf16.msra.mxu1 %v3886_v10  ;;  %v3470_v10 = vcombine.low %v2126_v4, %v2130_v5 }
 0x284   : > { %2005 = vmatprep.subr.bf16.mxu1 %v3891_v11  ;;  %v2134_v11 = vld [vmem:[%s4906_s5 + $0x380] sm:$0xff] }
 0x287   : > { %2006 = vmatpush1.bf16.msra.mxu1 %v3889_v12  ;;  %v2138_v12 = vld [vmem:[%s4906_s5 + $0x3a0] sm:$0xff] }
 0x288   : > { %2007 = vmatprep.subr.bf16.mxu1 %v3894_v13  ;;  %v2135_v13 = vld [vmem:[%s4906_s5 + $0x388] sm:$0xff]  ;;  %v3479_v14 = vcombine.high %v2134_v11, %v2138_v12 }
 0x289   : > { %v3481_v18 = vcombine.high %v2135_v13, %v2139_v15 }
 0x28b   : > { %2008 = vmatpush1.bf16.msra.mxu1 %v3892_v16  ;;  %v3478_v16 = vcombine.low %v2134_v11, %v2138_v12  ;;  %2901 = vmatprep.subr.bf16.mxu0 %v3481_v18  ;;  %v2057_v11 = vld [vmem:[%s4906_s5 + $0x118] sm:$0xff]  ;;  %v2068_v18 = vld [vmem:[%s4906_s5 + $0x170] sm:$0xff] }
 0x28c   : > { %2832 = vmatprep.subr.bf16.mxu1 %v3367_v17  ;;  %v3480_v17 = vcombine.low %v2135_v13, %v2139_v15  ;;  %v2061_v12 = vld [vmem:[%s4906_s5 + $0x138] sm:$0xff] }
 0x28e   : > { %2010 = vmatmul.mubr.bf16.vlgmr.msra.gmra.mrb[0].mxu1 %v1305_v22  ;;  %2902 = vmatpush1.bf16.msra.mxu0 %v3480_v17  ;;  %v2064_v17 = vld [vmem:[%s4906_s5 + $0x150] sm:$0xff] }
 0x28f   : > { %2833 = vmatpush1.bf16.msra.mxu1 %v3366_v20  ;;  %v2146_v20 = vld [vmem:[%s4906_s5 + $0x3e0] sm:$0xff] }
 0x290   : > { %2834 = vmatprep.subr.bf16.mxu1 %v3375_v21  ;;  %v2143_v21 = vld [vmem:[%s4906_s5 + $0x3c8] sm:$0xff]  ;;  %v3487_v22 = vcombine.high %v2142_v19, %v2146_v20  ;;  %v3486_v24 = vcombine.low %v2142_v19, %v2146_v20  ;;  %v2065_v19 = vld [vmem:[%s4906_s5 + $0x158] sm:$0xff] }
 0x291   : > { %v2069_v20 = vld [vmem:[%s4906_s5 + $0x178] sm:$0xff] }
 0x293   : > { %2835 = vmatpush1.bf16.msra.mxu1 %v3374_v25  ;;  %v3488_v25 = vcombine.low %v2143_v21, %v2147_v23 }
 0x294   : > { %2836 = vmatprep.subr.bf16.mxu1 %v3383_v26  ;;  %v3489_v26 = vcombine.high %v2143_v21, %v2147_v23  ;;  %v3411_v23 = vcombine.high %v2064_v17, %v2068_v18 }
 0x296   : > { %2903 = vmatprep.subr.bf16.mxu0 %v3489_v26  ;;  %v2076_v26 = vld [vmem:[%s4906_s5 + $0x1b0] sm:$0xff] }
 0x297   : > { %2837 = vmatpush1.bf16.msra.mxu1 %v3382_v28  ;;  %v2025_v28 = vld [vmem:[%s4906_s5 + $0x18] sm:$0xff]  ;;  %2904 = vmatpush1.bf16.msra.mxu0 %v3488_v25  ;;  %v2072_v25 = vld [vmem:[%s4906_s5 + $0x190] sm:$0xff] }
 0x298   : > { %2838 = vmatprep.subr.bf16.mxu1 %v3391_v29  ;;  %v3371_v29 = vcombine.high %v2024_v27, %v2028_v8  ;;  %v2073_v27 = vld [vmem:[%s4906_s5 + $0x198] sm:$0xff] }
 0x299   : > { %v2077_v8 = vld [vmem:[%s4906_s5 + $0x1b8] sm:$0xff] }
 0x29b   : > { %2839 = vmatpush1.bf16.msra.mxu1 %v3390_v32  ;;  %v3372_v32 = vcombine.low %v2025_v28, %v2029_v30 }
 0x29c   : > { %2840 = vmatprep.subr.bf16.mxu1 %v3399_v33  ;;  %v3373_v33 = vcombine.high %v2025_v28, %v2029_v30  ;;  %v3410_v28 = vcombine.low %v2064_v17, %v2068_v18  ;;  %v3419_v30 = vcombine.high %v2072_v25, %v2076_v26 }
 0x29e   : > { %2955 = vmatprep.subr.bf16.mxu0 %v3373_v33  ;;  %v2084_v33 = vld [vmem:[%s4906_s5 + $0x1f0] sm:$0xff] }
 0x29f   : > { %2841 = vmatpush1.bf16.msra.mxu1 %v3398_v36  ;;  %v1412_v36 = vrot.slane %v1403_v34, %v4454_v49  ;;  %v2081_v34 = vld [vmem:[%s4906_s5 + $0x1d8] sm:$0xff] }
 0x2a0   : > { %2842 = vmatprep.subr.bf16.mxu1 %v3407_v37 }
 0x2a3   : > { %2843 = vmatpush1.bf16.msra.mxu1 %v3406_v40 }
 0x2a4   : > { %2844 = vmatprep.subr.bf16.mxu1 %v3415_v41 }
 0x2a7   : > { %2845 = vmatpush1.bf16.msra.mxu1 %v3414_v44 }
 0x2a8   : > { %2846 = vmatprep.subr.bf16.mxu1 %v3423_v45  ;;  %v2032_v45 = vld [vmem:[%s4906_s5 + $0x50] sm:$0xff] }
 0x2ab   : > { %2847 = vmatpush1.bf16.msra.mxu1 %v3422_v51  ;;  %v2037_v51 = vld [vmem:[%s4906_s5 + $0x78] sm:$0xff] }
 0x2ac   : > { %2848 = vmatprep.subr.bf16.mxu1 %v3431_v52  ;;  %v3380_v59 = vcombine.low %v2033_v50, %v2037_v51 }
 0x2af   : > { %2849 = vmatpush1.bf16.msra.mxu1 %v3430_v55  ;;  %v3379_v55 = vcombine.high %v2032_v45, %v2036_v48 }
 0x2b0   : > { %2850 = vmatprep.subr.bf16.mxu1 %v3439_v60  ;;  %v3381_v60 = vcombine.high %v2033_v50, %v2037_v51  ;;  %v2096_v51 = vld [vmem:[%s4906_s5 + $0x250] sm:$0xff] }
 0x2b3   : > { %2851 = vmatpush1.bf16.msra.mxu1 %v3438_v57  ;;  %v2045_v57 = vld [vmem:[%s4906_s5 + $0xb8] sm:$0xff] }
 0x2b4   : > { %2852 = vmatprep.subr.bf16.mxu1 %v3447_v58  ;;  %v3378_v58 = vcombine.low %v2032_v45, %v2036_v48  ;;  %v3388_v4 = vcombine.low %v2041_v9, %v2045_v57 }
 0x2b7   : > { %2853 = vmatpush1.bf16.msra.mxu1 %v3446_v62  ;;  %v3389_v62 = vcombine.high %v2041_v9, %v2045_v57 }
 0x2b8   : > { %2854 = vmatprep.subr.bf16.mxu1 %v3455_v63  ;;  %v2048_v63 = vld [vmem:[%s4906_s5 + $0xd0] sm:$0xff] }
 0x2b9   : > { %v3395_v5 = vcombine.high %v2048_v63, %v2052_v0  ;;  %v3394_v13 = vcombine.low %v2048_v63, %v2052_v0 }
 0x2bb   : > { %2855 = vmatpush1.bf16.msra.mxu1 %v3454_v2  ;;  %v2053_v2 = vld [vmem:[%s4906_s5 + $0xf8] sm:$0xff] }
 0x2bc   : > { %2856 = vmatprep.subr.bf16.mxu1 %v3463_v3  ;;  %v3386_v3 = vcombine.low %v2040_v54, %v2044_v56  ;;  %v2097_v54 = vld [vmem:[%s4906_s5 + $0x258] sm:$0xff] }
 0x2bf   : > { %2857 = vmatpush1.bf16.msra.mxu1 %v3462_v7  ;;  %v3397_v7 = vcombine.high %v2049_v1, %v2053_v2 }
 0x2c0   : > { %2858 = vmatprep.subr.bf16.mxu1 %v3471_v6  ;;  %v2056_v6 = vld [vmem:[%s4906_s5 + $0x110] sm:$0xff] }
 0x2c3   : > { %2859 = vmatpush1.bf16.msra.mxu1 %v3470_v10  ;;  %v2060_v10 = vld [vmem:[%s4906_s5 + $0x130] sm:$0xff] }
 0x2c4   : > { %2860 = vmatprep.subr.bf16.mxu1 %v3479_v14  ;;  %v3396_v14 = vcombine.low %v2049_v1, %v2053_v2  ;;  %v3403_v15 = vcombine.high %v2056_v6, %v2060_v10  ;;  %v3402_v21 = vcombine.low %v2056_v6, %v2060_v10 }
 0x2c7   : > { %2861 = vmatpush1.bf16.msra.mxu1 %v3478_v16  ;;  %v3405_v16 = vcombine.high %v2057_v11, %v2061_v12 }
 0x2c8   : > { %2862 = vmatprep.subr.bf16.mxu1 %v3487_v22  ;;  %v3404_v22 = vcombine.low %v2057_v11, %v2061_v12 }
 0x2cb   : > { %2863 = vmatpush1.bf16.msra.mxu1 %v3486_v24  ;;  %v3413_v24 = vcombine.high %v2065_v19, %v2069_v20 }
 0x2cc   : > { %2914 = vmatprep.subr.bf16.mxu1 %v3371_v29  ;;  %v3412_v29 = vcombine.low %v2065_v19, %v2069_v20 }
 0x361   : > { %v2011_v37 = vpop.f32.mrb[0].mxu1 }
 0x362   : > { %v3508_v38 = vadd.f32 %v2011_v37, %v1408_v35  ;;  %v2013_v39 = vpop.f32.mrb[1].mxu1  ;;  %v2085_v35 = vld [vmem:[%s4906_s5 + $0x1f8] sm:$0xff]  ;;  %v3420_v37 = vcombine.low %v2073_v27, %v2077_v8 }
 0x363   : > { %v3509_v40 = vadd.f32 %v2013_v39, %v1412_v36  ;;  %v2015_v41 = vpop.f32.mrb[2].mxu1  ;;  %v3418_v36 = vcombine.low %v2072_v25, %v2076_v26  ;;  %v3429_v39 = vcombine.high %v2081_v34, %v2085_v35  ;;  %v3428_v45 = vcombine.low %v2081_v34, %v2085_v35 }
 0x364   : > { %v2018_v42 = vmax.f32 %v3508_v38, 0.0  ;;  %v2016_v43 = vpop.f32.mrb[3].mxu1  ;;  %v2092_v41 = vld [vmem:[%s4906_s5 + $0x230] sm:$0xff] }
 0x365   : > { %v2019_v44 = vmax.f32 %v3509_v40, 0.0  ;;  %v2088_v40 = vld [vmem:[%s4906_s5 + $0x210] sm:$0xff]  ;;  %v2093_v43 = vld [vmem:[%s4906_s5 + $0x238] sm:$0xff] }
 0x366   : > { %v4698_v53 = vpack.c.bf16 %v2018_v42, %v2018_v42  ;;  %v2089_v42 = vld [vmem:[%s4906_s5 + $0x218] sm:$0xff]  ;;  %v3435_v48 = vcombine.high %v2088_v40, %v2092_v41 }
 0x367   : > { %v2021_v52 = vpack.c.bf16 %v2019_v44, %v2019_v44  ;;  %v3437_v50 = vcombine.high %v2089_v42, %v2093_v43  ;;  %v3436_v56 = vcombine.low %v2089_v42, %v2093_v43 }
 0x369   : > { %2864 = vmatprep.mubr.bf16.mxu1 %v2021_v52  ;;  %2905 = vmatprep.mubr.bf16.mxu0 %v2021_v52 }
 0x36a   : > { %2865 = vmatmul.mubr.bf16.vlgmr.msra.gmra.mrb[4].mxu1 %v4698_v53  ;;  %2906 = vmatmul.mubr.bf16.vlgmr.msra.gmra.mrb[4].mxu0 %v4698_v53 }
 0x36b   : > { %2915 = vmatpush1.bf16.msra.mxu1 %v3370_v31  ;;  %2956 = vmatpush1.bf16.msra.mxu0 %v3372_v32  ;;  %v3421_v31 = vcombine.high %v2073_v27, %v2077_v8  ;;  %v2080_v32 = vld [vmem:[%s4906_s5 + $0x1d0] sm:$0xff] }
 0x36c   : > { %2946 = vmatprep.mubr.bf16.mxu1 %v2021_v52  ;;  %2987 = vmatprep.mubr.bf16.mxu0 %v2021_v52  ;;  %v3427_v38 = vcombine.high %v2080_v32, %v2084_v33  ;;  %v3426_v44 = vcombine.low %v2080_v32, %v2084_v33  ;;  %v2100_v52 = vld [vmem:[%s4906_s5 + $0x270] sm:$0xff] }
 0x36d   : > { %2916 = vmatprep.subr.bf16.mxu1 %v3379_v55  ;;  %2957 = vmatprep.subr.bf16.mxu0 %v3381_v60  ;;  %v2101_v55 = vld [vmem:[%s4906_s5 + $0x278] sm:$0xff]  ;;  %v3434_v60 = vcombine.low %v2088_v40, %v2092_v41  ;;  %v3443_v9 = vcombine.high %v2096_v51, %v2100_v52  ;;  %v3442_v63 = vcombine.low %v2096_v51, %v2100_v52  ;;  %v2166_v51 = vsub.s32 3, %v4445_v46 }
 0x36e   : > { %v3445_v57 = vcombine.high %v2097_v54, %v2101_v55  ;;  %v3444_v0 = vcombine.low %v2097_v54, %v2101_v55 }
 0x36f   : > { %2917 = vmatpush1.bf16.msra.mxu1 %v3378_v58  ;;  %2958 = vmatpush1.bf16.msra.mxu0 %v3380_v59  ;;  %v2104_v58 = vld [vmem:[%s4906_s5 + $0x290] sm:$0xff] }
 0x370   : > { %2918 = vmatprep.subr.bf16.mxu1 %v3387_v61  ;;  %2959 = vmatprep.subr.bf16.mxu0 %v3389_v62  ;;  %v2108_v59 = vld [vmem:[%s4906_s5 + $0x2b0] sm:$0xff]  ;;  %v2105_v61 = vld [vmem:[%s4906_s5 + $0x298] sm:$0xff] }
 0x371   : > { %v2109_v62 = vld [vmem:[%s4906_s5 + $0x2b8] sm:$0xff]  ;;  %v3451_v1 = vcombine.high %v2104_v58, %v2108_v59  ;;  %v3450_v6 = vcombine.low %v2104_v58, %v2108_v59 }
 0x372   : > { %v3453_v2 = vcombine.high %v2105_v61, %v2109_v62  ;;  %v3452_v10 = vcombine.low %v2105_v61, %v2109_v62 }
 0x373   : > { %2919 = vmatpush1.bf16.msra.mxu1 %v3386_v3  ;;  %2960 = vmatpush1.bf16.msra.mxu0 %v3388_v4  ;;  %v2112_v3 = vld [vmem:[%s4906_s5 + $0x2d0] sm:$0xff] }
 0x374   : > { %2920 = vmatprep.subr.bf16.mxu1 %v3395_v5  ;;  %2961 = vmatprep.subr.bf16.mxu0 %v3397_v7  ;;  %v2116_v4 = vld [vmem:[%s4906_s5 + $0x2f0] sm:$0xff]  ;;  %v2113_v5 = vld [vmem:[%s4906_s5 + $0x2d8] sm:$0xff] }
 0x375   : > { %v2117_v7 = vld [vmem:[%s4906_s5 + $0x2f8] sm:$0xff]  ;;  %v3459_v11 = vcombine.high %v2112_v3, %v2116_v4  ;;  %v3458_v17 = vcombine.low %v2112_v3, %v2116_v4 }
 0x376   : > { %v3461_v12 = vcombine.high %v2113_v5, %v2117_v7  ;;  %v3460_v18 = vcombine.low %v2113_v5, %v2117_v7 }
 0x377   : > { %2921 = vmatpush1.bf16.msra.mxu1 %v3394_v13  ;;  %2962 = vmatpush1.bf16.msra.mxu0 %v3396_v14  ;;  %v2120_v13 = vld [vmem:[%s4906_s5 + $0x310] sm:$0xff] }
 0x378   : > { %2922 = vmatprep.subr.bf16.mxu1 %v3403_v15  ;;  %2963 = vmatprep.subr.bf16.mxu0 %v3405_v16  ;;  %v2124_v14 = vld [vmem:[%s4906_s5 + $0x330] sm:$0xff]  ;;  %v2121_v15 = vld [vmem:[%s4906_s5 + $0x318] sm:$0xff] }
 0x379   : > { %v2125_v16 = vld [vmem:[%s4906_s5 + $0x338] sm:$0xff]  ;;  %v3467_v19 = vcombine.high %v2120_v13, %v2124_v14  ;;  %v3466_v25 = vcombine.low %v2120_v13, %v2124_v14 }
 0x37a   : > { %v3469_v20 = vcombine.high %v2121_v15, %v2125_v16  ;;  %v3468_v26 = vcombine.low %v2121_v15, %v2125_v16 }
 0x37b   : > { %2923 = vmatpush1.bf16.msra.mxu1 %v3402_v21  ;;  %2964 = vmatpush1.bf16.msra.mxu0 %v3404_v22  ;;  %v2128_v21 = vld [vmem:[%s4906_s5 + $0x350] sm:$0xff] }
 0x37c   : > { %2924 = vmatprep.subr.bf16.mxu1 %v3411_v23  ;;  %2965 = vmatprep.subr.bf16.mxu0 %v3413_v24  ;;  %v2132_v22 = vld [vmem:[%s4906_s5 + $0x370] sm:$0xff]  ;;  %v2129_v23 = vld [vmem:[%s4906_s5 + $0x358] sm:$0xff] }
 0x37d   : > { %v2133_v24 = vld [vmem:[%s4906_s5 + $0x378] sm:$0xff]  ;;  %v3475_v27 = vcombine.high %v2128_v21, %v2132_v22  ;;  %v3474_v32 = vcombine.low %v2128_v21, %v2132_v22  ;;  %v2174_v21 = vsub.s32 5, %v4445_v46  ;;  %v2182_v22 = vsub.s32 7, %v4445_v46 }
 0x37e   : > { %v3477_v8 = vcombine.high %v2129_v23, %v2133_v24  ;;  %v3476_v33 = vcombine.low %v2129_v23, %v2133_v24 }
 0x37f   : > { %2925 = vmatpush1.bf16.msra.mxu1 %v3410_v28  ;;  %2966 = vmatpush1.bf16.msra.mxu0 %v3412_v29  ;;  %v2136_v28 = vld [vmem:[%s4906_s5 + $0x390] sm:$0xff] }
 0x380   : > { %2926 = vmatprep.subr.bf16.mxu1 %v3419_v30  ;;  %2967 = vmatprep.subr.bf16.mxu0 %v3421_v31  ;;  %v2140_v29 = vld [vmem:[%s4906_s5 + $0x3b0] sm:$0xff]  ;;  %v2137_v30 = vld [vmem:[%s4906_s5 + $0x398] sm:$0xff] }
 0x381   : > { %v2141_v31 = vld [vmem:[%s4906_s5 + $0x3b8] sm:$0xff]  ;;  %v3483_v34 = vcombine.high %v2136_v28, %v2140_v29  ;;  %v3482_v40 = vcombine.low %v2136_v28, %v2140_v29 }
 0x382   : > { %v3485_v35 = vcombine.high %v2137_v30, %v2141_v31  ;;  %v3484_v41 = vcombine.low %v2137_v30, %v2141_v31  ;;  %v3898_v28 = vld [vmem:[%s4070_s23 + $0x18] sm:$0xff] }
 0x383   : > { %2927 = vmatpush1.bf16.msra.mxu1 %v3418_v36  ;;  %2968 = vmatpush1.bf16.msra.mxu0 %v3420_v37  ;;  %v2144_v36 = vld [vmem:[%s4906_s5 + $0x3d0] sm:$0xff]  ;;  %v3002_v29 = vunpack.c.l.bf16 %v3898_v28 }
 0x384   : > { %2928 = vmatprep.subr.bf16.mxu1 %v3427_v38  ;;  %2969 = vmatprep.subr.bf16.mxu0 %v3429_v39  ;;  %v2148_v37 = vld [vmem:[%s4906_s5 + $0x3f0] sm:$0xff]  ;;  %v2145_v38 = vld [vmem:[%s4906_s5 + $0x3d8] sm:$0xff] }
 0x385   : > { %v2149_v39 = vld [vmem:[%s4906_s5 + $0x3f8] sm:$0xff]  ;;  %v3491_v42 = vcombine.high %v2144_v36, %v2148_v37 }
 0x386   : > { %v3493_v43 = vcombine.high %v2145_v38, %v2149_v39 }
 0x387   : > { %2929 = vmatpush1.bf16.msra.mxu1 %v3426_v44  ;;  %2970 = vmatpush1.bf16.msra.mxu0 %v3428_v45  ;;  %v3490_v44 = vcombine.low %v2144_v36, %v2148_v37  ;;  %v3492_v45 = vcombine.low %v2145_v38, %v2149_v39 }
 0x388   : > { %2930 = vmatprep.subr.bf16.mxu1 %v3435_v48  ;;  %2971 = vmatprep.subr.bf16.mxu0 %v3437_v50  ;;  %v2162_v48 = vsub.s32 2, %v4445_v46  ;;  %v2150_v50 = vld [vmem:[%s4907_s6] sm:$0xff] }
 0x389   : > { %v2155_v52 = vrot.slane %v2150_v50, %v4448_v47  ;;  %v2159_v55 = vrot.slane %v2150_v50, %v4454_v49 }
 0x38a   : > { %v2163_v54 = vrot.slane %v2150_v50, %v2162_v48 }
 0x38b   : > { %2931 = vmatpush1.bf16.msra.mxu1 %v3434_v60  ;;  %2972 = vmatpush1.bf16.msra.mxu0 %v3436_v56  ;;  %v2167_v60 = vrot.slane %v2150_v50, %v2166_v51  ;;  %v3895_v56 = vld [vmem:[%s4070_s23] sm:$0xff] }
 0x38c   : > { %2932 = vmatprep.subr.bf16.mxu1 %v3443_v9  ;;  %2973 = vmatprep.subr.bf16.mxu0 %v3445_v57  ;;  %v2996_v9 = vunpack.c.l.bf16 %v3895_v56  ;;  %v3896_v57 = vld [vmem:[%s4070_s23 + $0x8] sm:$0xff]  ;;  %v2997_v61 = vunpack.c.h.bf16 %v3895_v56 }
 0x38d   : > { %v2998_v58 = vunpack.c.l.bf16 %v3896_v57  ;;  %v2999_v62 = vunpack.c.h.bf16 %v3896_v57 }
 0x38f   : > { %2933 = vmatpush1.bf16.msra.mxu1 %v3442_v63  ;;  %2974 = vmatpush1.bf16.msra.mxu0 %v3444_v0 }
 0x390   : > { %2934 = vmatprep.subr.bf16.mxu1 %v3451_v1  ;;  %2975 = vmatprep.subr.bf16.mxu0 %v3453_v2 }
 0x393   : > { %2935 = vmatpush1.bf16.msra.mxu1 %v3450_v6  ;;  %2976 = vmatpush1.bf16.msra.mxu0 %v3452_v10 }
 0x394   : > { %2936 = vmatprep.subr.bf16.mxu1 %v3459_v11  ;;  %2977 = vmatprep.subr.bf16.mxu0 %v3461_v12 }
 0x397   : > { %2937 = vmatpush1.bf16.msra.mxu1 %v3458_v17  ;;  %2978 = vmatpush1.bf16.msra.mxu0 %v3460_v18 }
 0x398   : > { %2938 = vmatprep.subr.bf16.mxu1 %v3467_v19  ;;  %2979 = vmatprep.subr.bf16.mxu0 %v3469_v20  ;;  %v2170_v19 = vsub.s32 4, %v4445_v46  ;;  %v2178_v20 = vsub.s32 6, %v4445_v46 }
 0x39a   : > { %v2171_v23 = vrot.slane %v2150_v50, %v2170_v19  ;;  %v2179_v24 = vrot.slane %v2150_v50, %v2178_v20 }
 0x39b   : > { %2939 = vmatpush1.bf16.msra.mxu1 %v3466_v25  ;;  %2980 = vmatpush1.bf16.msra.mxu0 %v3468_v26  ;;  %v2175_v25 = vrot.slane %v2150_v50, %v2174_v21  ;;  %v2183_v26 = vrot.slane %v2150_v50, %v2182_v22 }
 0x39c   : > { %2940 = vmatprep.subr.bf16.mxu1 %v3475_v27  ;;  %2981 = vmatprep.subr.bf16.mxu0 %v3477_v8  ;;  %v3897_v27 = vld [vmem:[%s4070_s23 + $0x10] sm:$0xff] }
 0x39d   : > { %v3000_v8 = vunpack.c.l.bf16 %v3897_v27 }
 0x39f   : > { %2941 = vmatpush1.bf16.msra.mxu1 %v3474_v32  ;;  %2982 = vmatpush1.bf16.msra.mxu0 %v3476_v33  ;;  %v3001_v32 = vunpack.c.h.bf16 %v3897_v27  ;;  %v3003_v33 = vunpack.c.h.bf16 %v3898_v28 }
 0x3a0   : > { %2942 = vmatprep.subr.bf16.mxu1 %v3483_v34  ;;  %2983 = vmatprep.subr.bf16.mxu0 %v3485_v35 }
 0x3a3   : > { %2943 = vmatpush1.bf16.msra.mxu1 %v3482_v40  ;;  %2984 = vmatpush1.bf16.msra.mxu0 %v3484_v41 }
 0x3a4   : > { %2944 = vmatprep.subr.bf16.mxu1 %v3491_v42  ;;  %2985 = vmatprep.subr.bf16.mxu0 %v3493_v43 }
 0x3a7   : > { %2945 = vmatpush1.bf16.msra.mxu1 %v3490_v44  ;;  %2986 = vmatpush1.bf16.msra.mxu0 %v3492_v45 }
 0x3aa   : > { %2947 = vmatmul.mubr.bf16.vlgmr.msra.gmra.mrb[8].mxu1 %v4698_v53  ;;  %2988 = vmatmul.mubr.bf16.vlgmr.msra.gmra.mrb[8].mxu0 %v4698_v53 }
 0x43d   : > { %v2866_v59 = vpop.f32.mrb[4].mxu1  ;;  %v2907_v53 = vpop.f32.mrb[4].mxu0 }
 0x43e   : > { %v2867_v63 = vadd.f32 %v2866_v59, %v2155_v52  ;;  %v2908_v0 = vadd.f32 %v2907_v53, %v2163_v54  ;;  %v2868_v1 = vpop.f32.mrb[5].mxu1  ;;  %v2909_v2 = vpop.f32.mrb[5].mxu0 }
 0x43f   : > { %v2869_v3 = vadd.f32 %v2868_v1, %v2159_v55  ;;  %v2910_v4 = vadd.f32 %v2909_v2, %v2167_v60  ;;  %v2870_v47 = vpop.f32.mrb[6].mxu1  ;;  %v2911_v5 = vpop.f32.mrb[6].mxu0 }
 0x440   : > { %v3004_v7 = vadd.f32 %v2996_v9, %v2867_v63  ;;  %v3006_v49 = vadd.f32 %v2998_v58, %v2908_v0  ;;  %v2871_v6 = vpop.f32.mrb[7].mxu1  ;;  %v2912_v10 = vpop.f32.mrb[7].mxu0 }
 0x441   : > { %v3005_v11 = vadd.f32 %v2997_v61, %v2869_v3  ;;  %v3007_v12 = vadd.f32 %v2999_v62, %v2910_v4 }
 0x442   : > { %v3012_v13 = vmax.f32 %v3004_v7, 0.0  ;;  %v3014_v14 = vmax.f32 %v3006_v49, 0.0 }
 0x443   : > { %v3013_v15 = vmax.f32 %v3005_v11, 0.0  ;;  %v3015_v16 = vmax.f32 %v3007_v12, 0.0 }
 0x445   : > { %v3502_v17 = vpack.c.bf16 %v3013_v15, %v3012_v13  ;;  %v3503_v18 = vpack.c.bf16 %v3015_v16, %v3014_v14 }
 0x447   : > { %3052 = vst [vmem:[%s4886_s30] sm:$0xff] %v3502_v17  ;;  %3053 = vst [vmem:[%s4886_s30 + $0x8] sm:$0xff] %v3503_v18 }
 0x47d   : > { %v2948_v30 = vpop.f32.mrb[8].mxu1  ;;  %v2989_v31 = vpop.f32.mrb[8].mxu0 }
 0x47e   : > { %v2949_v34 = vadd.f32 %v2948_v30, %v2171_v23  ;;  %v2990_v35 = vadd.f32 %v2989_v31, %v2179_v24  ;;  %v2950_v36 = vpop.f32.mrb[9].mxu1  ;;  %v2991_v37 = vpop.f32.mrb[9].mxu0 }
 0x47f   : > { %v2951_v38 = vadd.f32 %v2950_v36, %v2175_v25  ;;  %v2992_v39 = vadd.f32 %v2991_v37, %v2183_v26  ;;  %v2952_v46 = vpop.f32.mrb[10].mxu1  ;;  %v2993_v40 = vpop.f32.mrb[10].mxu0 }
 0x480   : > { %v3008_v41 = vadd.f32 %v3000_v8, %v2949_v34  ;;  %v3010_v42 = vadd.f32 %v3002_v29, %v2990_v35  ;;  %v2953_v43 = vpop.f32.mrb[11].mxu1  ;;  %v2994_v44 = vpop.f32.mrb[11].mxu0 }
 0x481   : > { %v3009_v45 = vadd.f32 %v3001_v32, %v2951_v38  ;;  %v3011_v48 = vadd.f32 %v3003_v33, %v2992_v39 }
 0x482   : > { %v3016_v50 = vmax.f32 %v3008_v41, 0.0  ;;  %v3018_v51 = vmax.f32 %v3010_v42, 0.0 }
 0x483   : > { %v3017_v52 = vmax.f32 %v3009_v45, 0.0  ;;  %v3019_v54 = vmax.f32 %v3011_v48, 0.0 }
 0x485   : > { %v3504_v55 = vpack.c.bf16 %v3017_v52, %v3016_v50  ;;  %v3505_v60 = vpack.c.bf16 %v3019_v54, %v3018_v51 }
 0x487   : > { %3054 = vst [vmem:[%s4886_s30 + $0x10] sm:$0xff] %v3504_v55  ;;  %3055 = vst [vmem:[%s4886_s30 + $0x18] sm:$0xff] %v3505_v60 }
 0x488 PF: > { %s18_s24 = sadd.s32 1, %s3937_s24  }
 0x489   : > { %p15_p3 = scmp.ge.s32.totalorder %s18_s24, 4  }
 0x48b   :  { %17 = sbr.rel (!%p15_p3) target bundleno = 1 (0x1), region = 83 }
 0x492   :  { %3077 = vsyncpa [#allocation3], 1 }
 0x493   :  { %3079 = vsyncpa [#allocation3 + $0x1], 1 }

</bundles_post_ra>
